<compile_context>
chip_gen: v7x
topology: tpu7x:2x2x1
jax: 0.10.0
libtpu: 0.0.40
codegen_flags: <defaults>
</compile_context>

<pallas_src>
import functools
import math

import jax
import jax.numpy as jnp
from jax import lax
from jax.experimental import pallas as pl
from jax.experimental.pallas import tpu as pltpu

KERNEL_SIZE = 7
PAD = KERNEL_SIZE // 2


def _spatial_attention_kernel(x_ref, m_ref, w_ref, b_ref, o_ref,
                              avg_sc, max_sc, *, NB, C, H, W):
    """One grid step = NB images stored as (NB*C, H*W) lane-dense rows.

    x_ref : (NB*C, HW)  input block (VMEM)
    m_ref : (16, HW)    rows 0..6 = column masks per dx, rows 8..14 = row
                        masks per dy (precomputed 0/1 f32)
    w_ref : (98,)       conv weights, SMEM  (c*49 + dy*7 + dx; c=0 avg, c=1 max)
    b_ref : (1,)        conv bias, SMEM
    o_ref : (NB*C, HW)  output block (VMEM)
    avg_sc/max_sc : (NB, HW) VMEM scratch - sublane-packed pooled maps
    """
    HW = H * W
    KS = KERNEL_SIZE

    # ---- channel pooling, sublane-packed into (NB, HW) slabs ---------------
    # Short static loop (NB is a small compile-time constant); each image is a
    # dense (C, HW) sub-slice of the block.
    for i in range(NB):
        xi = x_ref[pl.ds(i * C, C), :].astype(jnp.float32)        # (C, HW)
        avg_sc[pl.ds(i, 1), :] = jnp.mean(xi, axis=0, keepdims=True)
        max_sc[pl.ds(i, 1), :] = jnp.max(xi, axis=0, keepdims=True)

    avg_slab = avg_sc[...]                                        # (NB, HW)
    max_slab = max_sc[...]                                        # (NB, HW)

    # ---- conv weights: 98 scalar SMEM reads, hoisted once per block --------
    wa = [[w_ref[dy * KS + dx] for dx in range(KS)] for dy in range(KS)]
    wm = [[w_ref[KS * KS + dy * KS + dx] for dx in range(KS)] for dy in range(KS)]
    bias = b_ref[0]

    # ---- factored 2x7x7 conv ------------------------------------------------
    # dx stage: 7 column-shifted + column-masked copies of each pooled slab
    # (12 lane rolls per block), immediately folded into 7 per-dy weighted
    # accumulators so only ~9 slabs stay live.
    wsum = [None] * KS
    for dx in range(KS):
        sh = (PAD - dx) % HW
        ra = avg_slab if sh == 0 else pltpu.roll(avg_slab, shift=sh, axis=1)
        rm = max_slab if sh == 0 else pltpu.roll(max_slab, shift=sh, axis=1)
        cmask = m_ref[pl.ds(dx, 1), :]                            # (1, HW)
        ra = ra * cmask
        rm = rm * cmask
        for dy in range(KS):
            term = wa[dy][dx] * ra + wm[dy][dx] * rm
            wsum[dy] = term if wsum[dy] is None else wsum[dy] + term

    # dy stage: 6 more lane rolls (row shifts, multiples of W) + row masks.
    conv = None
    for dy in range(KS):
        shy = ((PAD - dy) * W) % HW
        r = wsum[dy] if shy == 0 else pltpu.roll(wsum[dy], shift=shy, axis=1)
        contrib = r * m_ref[pl.ds(8 + dy, 1), :]
        conv = contrib if conv is None else conv + contrib

    att = jax.nn.sigmoid(conv + bias)                             # (NB, HW) f32

    # ---- broadcast multiply + lane-dense store ------------------------------
    for i in range(NB):
        xi = x_ref[pl.ds(i * C, C), :].astype(jnp.float32)        # (C, HW)
        scaled = xi * att[i:i + 1, :]                             # sublane bcast
        o_ref[pl.ds(i * C, C), :] = scaled.astype(o_ref.dtype)


def spatial_attention(x, conv_w, conv_b):
    """x: (N, C, H, W); conv_w: (1, 2, 7, 7); conv_b: (1,)."""
    N, C, H, W = x.shape
    HW = H * W
    KS = KERNEL_SIZE

    # ---- batch blocking ------------------------------------------------------
    # NB images per grid step.  Constraints:
    #   * NB*C multiple of 8 (dense sublane tiles) unless a single block covers
    #     the whole (padded) batch,
    #   * input block <= ~4 MiB and conv slab intermediates modest, so the
    #     double-buffered pipeline stays well inside VMEM on 64-MiB v7x,
    #   * >=2 "parallel" grid steps when the batch allows (dual-TC v7x).
    bytes_per_image = C * HW * 4
    align = 8 // math.gcd(C, 8)                   # NB granularity for NB*C % 8 == 0
    in_budget = 4 << 20                           # per-block input budget
    slab_budget = 1 << 20                         # per (NB, HW) f32 conv slab
    nb = min(N, 8,
             max(1, in_budget // bytes_per_image),
             max(1, slab_budget // (HW * 4)))
    nb = max(align, (nb // align) * align)
    if nb >= N and N > align:                     # split so both v7x TCs get work
        nb = max(align, ((-(-N // 2)) // align) * align)
    NB = nb
    G = -(-N // NB)                               # ceil div
    Npad = G * NB

    if Npad != N:
        x = jnp.pad(x, ((0, Npad - N), (0, 0), (0, 0), (0, 0)))

    x2 = x.reshape(Npad * C, HW)                  # lane/sublane-dense 2-D view
    w_flat = conv_w.reshape(-1).astype(jnp.float32)    # (98,)  c*49 + dy*7 + dx
    b = conv_b.reshape(-1).astype(jnp.float32)         # (1,)

    # ---- exact precomputed zero-padding masks (no in-kernel modulo) --------
    pos = jnp.arange(HW, dtype=jnp.int32)
    col = pos % W
    col_masks = jnp.stack([
        ((col >= PAD - dx) & (col < W + PAD - dx)).astype(jnp.float32)
        for dx in range(KS)])                                       # (7, HW)
    row_masks = jnp.stack([
        ((pos >= (PAD - dy) * W) & (pos < (H + PAD - dy) * W)).astype(jnp.float32)
        for dy in range(KS)])                                       # (7, HW)
    masks = jnp.zeros((16, HW), jnp.float32)
    masks = masks.at[0:KS].set(col_masks).at[8:8 + KS].set(row_masks)

    NBC = NB * C
    kernel = functools.partial(_spatial_attention_kernel, NB=NB, C=C, H=H, W=W)

    out2 = pl.pallas_call(
        kernel,
        out_shape=jax.ShapeDtypeStruct((Npad * C, HW), x.dtype),
        grid=(G,),
        in_specs=[
            pl.BlockSpec((NBC, HW), lambda g: (g, 0)),              # x block
            pl.BlockSpec((16, HW), lambda g: (0, 0)),               # masks
            pl.BlockSpec(memory_space=pltpu.MemorySpace.SMEM),      # weights
            pl.BlockSpec(memory_space=pltpu.MemorySpace.SMEM),      # bias
        ],
        out_specs=pl.BlockSpec((NBC, HW), lambda g: (g, 0)),
        scratch_shapes=[
            pltpu.VMEM((NB, HW), jnp.float32),                      # avg slab
            pltpu.VMEM((NB, HW), jnp.float32),                      # max slab
        ],
        compiler_params=pltpu.CompilerParams(
            dimension_semantics=("parallel",),
            vmem_limit_bytes=32 * 1024 * 1024,
        ),
    )(x2, masks, w_flat, b)

    out = out2.reshape(Npad, C, H, W)
    return out[:N] if Npad != N else out


def spatial_attention_ref(x, conv_w, conv_b):
    """Pure-JAX reference matching the PyTorch forward."""
    avg = jnp.mean(x, axis=1, keepdims=True)
    mx = jnp.max(x, axis=1, keepdims=True)
    att_in = jnp.concatenate([avg, mx], axis=1)        # (N, 2, H, W)
    conv = lax.conv_general_dilated(
        att_in, conv_w, window_strides=(1, 1),
        padding=[(PAD, PAD), (PAD, PAD)],
        dimension_numbers=("NCHW", "OIHW", "NCHW"),
    ) + conv_b.reshape(1, 1, 1, 1)
    return x * jax.nn.sigmoid(conv)


if __name__ == "__main__":
    key = jax.random.PRNGKey(0)
    kx, kw, kb = jax.random.split(key, 3)

    N, C, H, W = 2, 4, 16, 16
    x = jax.random.normal(kx, (N, C, H, W), dtype=jnp.float32)

    # Deterministic parameter init (Conv2d(2, 1, 7, padding=3, bias=True)).
    fan_in = 2 * KERNEL_SIZE * KERNEL_SIZE
    bound = 1.0 / (fan_in ** 0.5)
    conv_w = jax.random.uniform(kw, (1, 2, KERNEL_SIZE, KERNEL_SIZE),
                                minval=-bound, maxval=bound, dtype=jnp.float32)
    conv_b = jax.random.uniform(kb, (1,), minval=-bound, maxval=bound,
                                dtype=jnp.float32)

    out = jax.block_until_ready(spatial_attention(x, conv_w, conv_b))
    ref = jax.block_until_ready(spatial_attention_ref(x, conv_w, conv_b))

    assert out.shape == (N, C, H, W)
    assert jnp.allclose(out, ref, atol=1e-5, rtol=1e-5), "mismatch vs reference"
    print("KERNEL_OK")
</pallas_src>

<mosaic_0001>
module attributes {stable_mosaic.version = 11 : i64} {
  func.func @_spatial_attention_kernel(%arg0: i32, %arg1: memref<8x256xf32, #tpu.memory_space<vmem>>, %arg2: memref<16x256xf32, #tpu.memory_space<vmem>>, %arg3: memref<98xf32, #tpu.memory_space<smem>>, %arg4: memref<1xf32, #tpu.memory_space<smem>>, %arg5: memref<8x256xf32, #tpu.memory_space<vmem>>, %arg6: memref<2x256xf32, #tpu.memory_space<vmem>>, %arg7: memref<2x256xf32, #tpu.memory_space<vmem>>) attributes {dimension_semantics = [#tpu.dimension_semantics<parallel>], iteration_bounds = array<i64: 1>, scalar_prefetch = 0 : i64, scratch_operands = 2 : i64, tpu.core_type = #tpu.core_type<tc>, window_params = [{transform_indices = @transform_0, window_bounds = array<i64: 8, 256>}, {pipeline_mode = #tpu.pipeline_mode<synchronous>, transform_indices = @transform_1, window_bounds = array<i64: 16, 256>}, {transform_indices = @transform_2, window_bounds = array<i64: 98>}, {transform_indices = @transform_3, window_bounds = array<i64: 1>}, {transform_indices = @transform_4, window_bounds = array<i64: 8, 256>}]} {
    %c0 = arith.constant 0 : index
    %c0_0 = arith.constant 0 : index
    %0 = vector.load %arg1[%c0, %c0_0] : memref<8x256xf32, #tpu.memory_space<vmem>>, vector<4x256xf32>
    %cst = arith.constant dense<0.000000e+00> : vector<256xf32>
    %1 = vector.multi_reduction <add>, %0, %cst [0] : vector<4x256xf32> to vector<256xf32>
    %2 = vector.shape_cast %1 : vector<256xf32> to vector<1x256xf32>
    %cst_1 = arith.constant 4.000000e+00 : f32
    %3 = vector.broadcast %cst_1 : f32 to vector<1x256xf32>
    %4 = arith.divf %2, %3 : vector<1x256xf32>
    %c0_2 = arith.constant 0 : index
    %c0_3 = arith.constant 0 : index
    %5 = vector.load %arg6[%c0_2, %c0_3] : memref<2x256xf32, #tpu.memory_space<vmem>>, vector<1x256xf32>
    tpu.vector_store %arg6[%c0_2, %c0_3], %4 {strides = array<i32>} : memref<2x256xf32, #tpu.memory_space<vmem>>, vector<1x256xf32>,
    %cst_4 = arith.constant dense<0xFF800000> : vector<256xf32>
    %6 = vector.multi_reduction <maximumf>, %0, %cst_4 [0] : vector<4x256xf32> to vector<256xf32>
    %7 = vector.shape_cast %6 : vector<256xf32> to vector<1x256xf32>
    %c0_5 = arith.constant 0 : index
    %c0_6 = arith.constant 0 : index
    %8 = vector.load %arg7[%c0_5, %c0_6] : memref<2x256xf32, #tpu.memory_space<vmem>>, vector<1x256xf32>
    tpu.vector_store %arg7[%c0_5, %c0_6], %7 {strides = array<i32>} : memref<2x256xf32, #tpu.memory_space<vmem>>, vector<1x256xf32>,
    %c4 = arith.constant 4 : index
    %c0_7 = arith.constant 0 : index
    %9 = vector.load %arg1[%c4, %c0_7] : memref<8x256xf32, #tpu.memory_space<vmem>>, vector<4x256xf32>
    %cst_8 = arith.constant dense<0.000000e+00> : vector<256xf32>
    %10 = vector.multi_reduction <add>, %9, %cst_8 [0] : vector<4x256xf32> to vector<256xf32>
    %11 = vector.shape_cast %10 : vector<256xf32> to vector<1x256xf32>
    %cst_9 = arith.constant 4.000000e+00 : f32
    %12 = vector.broadcast %cst_9 : f32 to vector<1x256xf32>
    %13 = arith.divf %11, %12 : vector<1x256xf32>
    %c1 = arith.constant 1 : index
    %c0_10 = arith.constant 0 : index
    %14 = vector.load %arg6[%c1, %c0_10] : memref<2x256xf32, #tpu.memory_space<vmem>>, vector<1x256xf32>
    tpu.vector_store %arg6[%c1, %c0_10], %13 {strides = array<i32>} : memref<2x256xf32, #tpu.memory_space<vmem>>, vector<1x256xf32>,
    %cst_11 = arith.constant dense<0xFF800000> : vector<256xf32>
    %15 = vector.multi_reduction <maximumf>, %9, %cst_11 [0] : vector<4x256xf32> to vector<256xf32>
    %16 = vector.shape_cast %15 : vector<256xf32> to vector<1x256xf32>
    %c1_12 = arith.constant 1 : index
    %c0_13 = arith.constant 0 : index
    %17 = vector.load %arg7[%c1_12, %c0_13] : memref<2x256xf32, #tpu.memory_space<vmem>>, vector<1x256xf32>
    tpu.vector_store %arg7[%c1_12, %c0_13], %16 {strides = array<i32>} : memref<2x256xf32, #tpu.memory_space<vmem>>, vector<1x256xf32>,
    %c0_14 = arith.constant 0 : index
    %c0_15 = arith.constant 0 : index
    %18 = vector.load %arg6[%c0_14, %c0_15] : memref<2x256xf32, #tpu.memory_space<vmem>>, vector<2x256xf32>
    %c0_16 = arith.constant 0 : index
    %c0_17 = arith.constant 0 : index
    %19 = vector.load %arg7[%c0_16, %c0_17] : memref<2x256xf32, #tpu.memory_space<vmem>>, vector<2x256xf32>
    %c0_18 = arith.constant 0 : index
    %20 = memref.load %arg3[%c0_18] : memref<98xf32, #tpu.memory_space<smem>>
    %c1_19 = arith.constant 1 : index
    %21 = memref.load %arg3[%c1_19] : memref<98xf32, #tpu.memory_space<smem>>
    %c2 = arith.constant 2 : index
    %22 = memref.load %arg3[%c2] : memref<98xf32, #tpu.memory_space<smem>>
    %c3 = arith.constant 3 : index
    %23 = memref.load %arg3[%c3] : memref<98xf32, #tpu.memory_space<smem>>
    %c4_20 = arith.constant 4 : index
    %24 = memref.load %arg3[%c4_20] : memref<98xf32, #tpu.memory_space<smem>>
    %c5 = arith.constant 5 : index
    %25 = memref.load %arg3[%c5] : memref<98xf32, #tpu.memory_space<smem>>
    %c6 = arith.constant 6 : index
    %26 = memref.load %arg3[%c6] : memref<98xf32, #tpu.memory_space<smem>>
    %c7 = arith.constant 7 : index
    %27 = memref.load %arg3[%c7] : memref<98xf32, #tpu.memory_space<smem>>
    %c8 = arith.constant 8 : index
    %28 = memref.load %arg3[%c8] : memref<98xf32, #tpu.memory_space<smem>>
    %c9 = arith.constant 9 : index
    %29 = memref.load %arg3[%c9] : memref<98xf32, #tpu.memory_space<smem>>
    %c10 = arith.constant 10 : index
    %30 = memref.load %arg3[%c10] : memref<98xf32, #tpu.memory_space<smem>>
    %c11 = arith.constant 11 : index
    %31 = memref.load %arg3[%c11] : memref<98xf32, #tpu.memory_space<smem>>
    %c12 = arith.constant 12 : index
    %32 = memref.load %arg3[%c12] : memref<98xf32, #tpu.memory_space<smem>>
    %c13 = arith.constant 13 : index
    %33 = memref.load %arg3[%c13] : memref<98xf32, #tpu.memory_space<smem>>
    %c14 = arith.constant 14 : index
    %34 = memref.load %arg3[%c14] : memref<98xf32, #tpu.memory_space<smem>>
    %c15 = arith.constant 15 : index
    %35 = memref.load %arg3[%c15] : memref<98xf32, #tpu.memory_space<smem>>
    %c16 = arith.constant 16 : index
    %36 = memref.load %arg3[%c16] : memref<98xf32, #tpu.memory_space<smem>>
    %c17 = arith.constant 17 : index
    %37 = memref.load %arg3[%c17] : memref<98xf32, #tpu.memory_space<smem>>
    %c18 = arith.constant 18 : index
    %38 = memref.load %arg3[%c18] : memref<98xf32, #tpu.memory_space<smem>>
    %c19 = arith.constant 19 : index
    %39 = memref.load %arg3[%c19] : memref<98xf32, #tpu.memory_space<smem>>
    %c20 = arith.constant 20 : index
    %40 = memref.load %arg3[%c20] : memref<98xf32, #tpu.memory_space<smem>>
    %c21 = arith.constant 21 : index
    %41 = memref.load %arg3[%c21] : memref<98xf32, #tpu.memory_space<smem>>
    %c22 = arith.constant 22 : index
    %42 = memref.load %arg3[%c22] : memref<98xf32, #tpu.memory_space<smem>>
    %c23 = arith.constant 23 : index
    %43 = memref.load %arg3[%c23] : memref<98xf32, #tpu.memory_space<smem>>
    %c24 = arith.constant 24 : index
    %44 = memref.load %arg3[%c24] : memref<98xf32, #tpu.memory_space<smem>>
    %c25 = arith.constant 25 : index
    %45 = memref.load %arg3[%c25] : memref<98xf32, #tpu.memory_space<smem>>
    %c26 = arith.constant 26 : index
    %46 = memref.load %arg3[%c26] : memref<98xf32, #tpu.memory_space<smem>>
    %c27 = arith.constant 27 : index
    %47 = memref.load %arg3[%c27] : memref<98xf32, #tpu.memory_space<smem>>
    %c28 = arith.constant 28 : index
    %48 = memref.load %arg3[%c28] : memref<98xf32, #tpu.memory_space<smem>>
    %c29 = arith.constant 29 : index
    %49 = memref.load %arg3[%c29] : memref<98xf32, #tpu.memory_space<smem>>
    %c30 = arith.constant 30 : index
    %50 = memref.load %arg3[%c30] : memref<98xf32, #tpu.memory_space<smem>>
    %c31 = arith.constant 31 : index
    %51 = memref.load %arg3[%c31] : memref<98xf32, #tpu.memory_space<smem>>
    %c32 = arith.constant 32 : index
    %52 = memref.load %arg3[%c32] : memref<98xf32, #tpu.memory_space<smem>>
    %c33 = arith.constant 33 : index
    %53 = memref.load %arg3[%c33] : memref<98xf32, #tpu.memory_space<smem>>
    %c34 = arith.constant 34 : index
    %54 = memref.load %arg3[%c34] : memref<98xf32, #tpu.memory_space<smem>>
    %c35 = arith.constant 35 : index
    %55 = memref.load %arg3[%c35] : memref<98xf32, #tpu.memory_space<smem>>
    %c36 = arith.constant 36 : index
    %56 = memref.load %arg3[%c36] : memref<98xf32, #tpu.memory_space<smem>>
    %c37 = arith.constant 37 : index
    %57 = memref.load %arg3[%c37] : memref<98xf32, #tpu.memory_space<smem>>
    %c38 = arith.constant 38 : index
    %58 = memref.load %arg3[%c38] : memref<98xf32, #tpu.memory_space<smem>>
    %c39 = arith.constant 39 : index
    %59 = memref.load %arg3[%c39] : memref<98xf32, #tpu.memory_space<smem>>
    %c40 = arith.constant 40 : index
    %60 = memref.load %arg3[%c40] : memref<98xf32, #tpu.memory_space<smem>>
    %c41 = arith.constant 41 : index
    %61 = memref.load %arg3[%c41] : memref<98xf32, #tpu.memory_space<smem>>
    %c42 = arith.constant 42 : index
    %62 = memref.load %arg3[%c42] : memref<98xf32, #tpu.memory_space<smem>>
    %c43 = arith.constant 43 : index
    %63 = memref.load %arg3[%c43] : memref<98xf32, #tpu.memory_space<smem>>
    %c44 = arith.constant 44 : index
    %64 = memref.load %arg3[%c44] : memref<98xf32, #tpu.memory_space<smem>>
    %c45 = arith.constant 45 : index
    %65 = memref.load %arg3[%c45] : memref<98xf32, #tpu.memory_space<smem>>
    %c46 = arith.constant 46 : index
    %66 = memref.load %arg3[%c46] : memref<98xf32, #tpu.memory_space<smem>>
    %c47 = arith.constant 47 : index
    %67 = memref.load %arg3[%c47] : memref<98xf32, #tpu.memory_space<smem>>
    %c48 = arith.constant 48 : index
    %68 = memref.load %arg3[%c48] : memref<98xf32, #tpu.memory_space<smem>>
    %c49 = arith.constant 49 : index
    %69 = memref.load %arg3[%c49] : memref<98xf32, #tpu.memory_space<smem>>
    %c50 = arith.constant 50 : index
    %70 = memref.load %arg3[%c50] : memref<98xf32, #tpu.memory_space<smem>>
    %c51 = arith.constant 51 : index
    %71 = memref.load %arg3[%c51] : memref<98xf32, #tpu.memory_space<smem>>
    %c52 = arith.constant 52 : index
    %72 = memref.load %arg3[%c52] : memref<98xf32, #tpu.memory_space<smem>>
    %c53 = arith.constant 53 : index
    %73 = memref.load %arg3[%c53] : memref<98xf32, #tpu.memory_space<smem>>
    %c54 = arith.constant 54 : index
    %74 = memref.load %arg3[%c54] : memref<98xf32, #tpu.memory_space<smem>>
    %c55 = arith.constant 55 : index
    %75 = memref.load %arg3[%c55] : memref<98xf32, #tpu.memory_space<smem>>
    %c56 = arith.constant 56 : index
    %76 = memref.load %arg3[%c56] : memref<98xf32, #tpu.memory_space<smem>>
    %c57 = arith.constant 57 : index
    %77 = memref.load %arg3[%c57] : memref<98xf32, #tpu.memory_space<smem>>
    %c58 = arith.constant 58 : index
    %78 = memref.load %arg3[%c58] : memref<98xf32, #tpu.memory_space<smem>>
    %c59 = arith.constant 59 : index
    %79 = memref.load %arg3[%c59] : memref<98xf32, #tpu.memory_space<smem>>
    %c60 = arith.constant 60 : index
    %80 = memref.load %arg3[%c60] : memref<98xf32, #tpu.memory_space<smem>>
    %c61 = arith.constant 61 : index
    %81 = memref.load %arg3[%c61] : memref<98xf32, #tpu.memory_space<smem>>
    %c62 = arith.constant 62 : index
    %82 = memref.load %arg3[%c62] : memref<98xf32, #tpu.memory_space<smem>>
    %c63 = arith.constant 63 : index
    %83 = memref.load %arg3[%c63] : memref<98xf32, #tpu.memory_space<smem>>
    %c64 = arith.constant 64 : index
    %84 = memref.load %arg3[%c64] : memref<98xf32, #tpu.memory_space<smem>>
    %c65 = arith.constant 65 : index
    %85 = memref.load %arg3[%c65] : memref<98xf32, #tpu.memory_space<smem>>
    %c66 = arith.constant 66 : index
    %86 = memref.load %arg3[%c66] : memref<98xf32, #tpu.memory_space<smem>>
    %c67 = arith.constant 67 : index
    %87 = memref.load %arg3[%c67] : memref<98xf32, #tpu.memory_space<smem>>
    %c68 = arith.constant 68 : index
    %88 = memref.load %arg3[%c68] : memref<98xf32, #tpu.memory_space<smem>>
    %c69 = arith.constant 69 : index
    %89 = memref.load %arg3[%c69] : memref<98xf32, #tpu.memory_space<smem>>
    %c70 = arith.constant 70 : index
    %90 = memref.load %arg3[%c70] : memref<98xf32, #tpu.memory_space<smem>>
    %c71 = arith.constant 71 : index
    %91 = memref.load %arg3[%c71] : memref<98xf32, #tpu.memory_space<smem>>
    %c72 = arith.constant 72 : index
    %92 = memref.load %arg3[%c72] : memref<98xf32, #tpu.memory_space<smem>>
    %c73 = arith.constant 73 : index
    %93 = memref.load %arg3[%c73] : memref<98xf32, #tpu.memory_space<smem>>
    %c74 = arith.constant 74 : index
    %94 = memref.load %arg3[%c74] : memref<98xf32, #tpu.memory_space<smem>>
    %c75 = arith.constant 75 : index
    %95 = memref.load %arg3[%c75] : memref<98xf32, #tpu.memory_space<smem>>
    %c76 = arith.constant 76 : index
    %96 = memref.load %arg3[%c76] : memref<98xf32, #tpu.memory_space<smem>>
    %c77 = arith.constant 77 : index
    %97 = memref.load %arg3[%c77] : memref<98xf32, #tpu.memory_space<smem>>
    %c78 = arith.constant 78 : index
    %98 = memref.load %arg3[%c78] : memref<98xf32, #tpu.memory_space<smem>>
    %c79 = arith.constant 79 : index
    %99 = memref.load %arg3[%c79] : memref<98xf32, #tpu.memory_space<smem>>
    %c80 = arith.constant 80 : index
    %100 = memref.load %arg3[%c80] : memref<98xf32, #tpu.memory_space<smem>>
    %c81 = arith.constant 81 : index
    %101 = memref.load %arg3[%c81] : memref<98xf32, #tpu.memory_space<smem>>
    %c82 = arith.constant 82 : index
    %102 = memref.load %arg3[%c82] : memref<98xf32, #tpu.memory_space<smem>>
    %c83 = arith.constant 83 : index
    %103 = memref.load %arg3[%c83] : memref<98xf32, #tpu.memory_space<smem>>
    %c84 = arith.constant 84 : index
    %104 = memref.load %arg3[%c84] : memref<98xf32, #tpu.memory_space<smem>>
    %c85 = arith.constant 85 : index
    %105 = memref.load %arg3[%c85] : memref<98xf32, #tpu.memory_space<smem>>
    %c86 = arith.constant 86 : index
    %106 = memref.load %arg3[%c86] : memref<98xf32, #tpu.memory_space<smem>>
    %c87 = arith.constant 87 : index
    %107 = memref.load %arg3[%c87] : memref<98xf32, #tpu.memory_space<smem>>
    %c88 = arith.constant 88 : index
    %108 = memref.load %arg3[%c88] : memref<98xf32, #tpu.memory_space<smem>>
    %c89 = arith.constant 89 : index
    %109 = memref.load %arg3[%c89] : memref<98xf32, #tpu.memory_space<smem>>
    %c90 = arith.constant 90 : index
    %110 = memref.load %arg3[%c90] : memref<98xf32, #tpu.memory_space<smem>>
    %c91 = arith.constant 91 : index
    %111 = memref.load %arg3[%c91] : memref<98xf32, #tpu.memory_space<smem>>
    %c92 = arith.constant 92 : index
    %112 = memref.load %arg3[%c92] : memref<98xf32, #tpu.memory_space<smem>>
    %c93 = arith.constant 93 : index
    %113 = memref.load %arg3[%c93] : memref<98xf32, #tpu.memory_space<smem>>
    %c94 = arith.constant 94 : index
    %114 = memref.load %arg3[%c94] : memref<98xf32, #tpu.memory_space<smem>>
    %c95 = arith.constant 95 : index
    %115 = memref.load %arg3[%c95] : memref<98xf32, #tpu.memory_space<smem>>
    %c96 = arith.constant 96 : index
    %116 = memref.load %arg3[%c96] : memref<98xf32, #tpu.memory_space<smem>>
    %c97 = arith.constant 97 : index
    %117 = memref.load %arg3[%c97] : memref<98xf32, #tpu.memory_space<smem>>
    %c0_21 = arith.constant 0 : index
    %118 = memref.load %arg4[%c0_21] : memref<1xf32, #tpu.memory_space<smem>>
    %c3_i32 = arith.constant 3 : i32
    %119 = tpu.dynamic_rotate %18 by %c3_i32 dim 1 : vector<2x256xf32>, i32 -> vector<2x256xf32>
    %c3_i32_22 = arith.constant 3 : i32
    %120 = tpu.dynamic_rotate %19 by %c3_i32_22 dim 1 : vector<2x256xf32>, i32 -> vector<2x256xf32>
    %c0_23 = arith.constant 0 : index
    %c0_24 = arith.constant 0 : index
    %121 = vector.load %arg2[%c0_23, %c0_24] : memref<16x256xf32, #tpu.memory_space<vmem>>, vector<1x256xf32>
    %122 = vector.broadcast %121 : vector<1x256xf32> to vector<2x256xf32>
    %123 = arith.mulf %119, %122 : vector<2x256xf32>
    %124 = vector.broadcast %121 : vector<1x256xf32> to vector<2x256xf32>
    %125 = arith.mulf %120, %124 : vector<2x256xf32>
    %126 = vector.broadcast %20 : f32 to vector<2x256xf32>
    %127 = arith.mulf %126, %123 : vector<2x256xf32>
    %128 = vector.broadcast %69 : f32 to vector<2x256xf32>
    %129 = arith.mulf %128, %125 : vector<2x256xf32>
    %130 = arith.addf %127, %129 : vector<2x256xf32>
    %131 = vector.broadcast %27 : f32 to vector<2x256xf32>
    %132 = arith.mulf %131, %123 : vector<2x256xf32>
    %133 = vector.broadcast %76 : f32 to vector<2x256xf32>
    %134 = arith.mulf %133, %125 : vector<2x256xf32>
    %135 = arith.addf %132, %134 : vector<2x256xf32>
    %136 = vector.broadcast %34 : f32 to vector<2x256xf32>
    %137 = arith.mulf %136, %123 : vector<2x256xf32>
    %138 = vector.broadcast %83 : f32 to vector<2x256xf32>
    %139 = arith.mulf %138, %125 : vector<2x256xf32>
    %140 = arith.addf %137, %139 : vector<2x256xf32>
    %141 = vector.broadcast %41 : f32 to vector<2x256xf32>
    %142 = arith.mulf %141, %123 : vector<2x256xf32>
    %143 = vector.broadcast %90 : f32 to vector<2x256xf32>
    %144 = arith.mulf %143, %125 : vector<2x256xf32>
    %145 = arith.addf %142, %144 : vector<2x256xf32>
    %146 = vector.broadcast %48 : f32 to vector<2x256xf32>
    %147 = arith.mulf %146, %123 : vector<2x256xf32>
    %148 = vector.broadcast %97 : f32 to vector<2x256xf32>
    %149 = arith.mulf %148, %125 : vector<2x256xf32>
    %150 = arith.addf %147, %149 : vector<2x256xf32>
    %151 = vector.broadcast %55 : f32 to vector<2x256xf32>
    %152 = arith.mulf %151, %123 : vector<2x256xf32>
    %153 = vector.broadcast %104 : f32 to vector<2x256xf32>
    %154 = arith.mulf %153, %125 : vector<2x256xf32>
    %155 = arith.addf %152, %154 : vector<2x256xf32>
    %156 = vector.broadcast %62 : f32 to vector<2x256xf32>
    %157 = arith.mulf %156, %123 : vector<2x256xf32>
    %158 = vector.broadcast %111 : f32 to vector<2x256xf32>
    %159 = arith.mulf %158, %125 : vector<2x256xf32>
    %160 = arith.addf %157, %159 : vector<2x256xf32>
    %c2_i32 = arith.constant 2 : i32
    %161 = tpu.dynamic_rotate %18 by %c2_i32 dim 1 : vector<2x256xf32>, i32 -> vector<2x256xf32>
    %c2_i32_25 = arith.constant 2 : i32
    %162 = tpu.dynamic_rotate %19 by %c2_i32_25 dim 1 : vector<2x256xf32>, i32 -> vector<2x256xf32>
    %c1_26 = arith.constant 1 : index
    %c0_27 = arith.constant 0 : index
    %163 = vector.load %arg2[%c1_26, %c0_27] : memref<16x256xf32, #tpu.memory_space<vmem>>, vector<1x256xf32>
    %164 = vector.broadcast %163 : vector<1x256xf32> to vector<2x256xf32>
    %165 = arith.mulf %161, %164 : vector<2x256xf32>
    %166 = vector.broadcast %163 : vector<1x256xf32> to vector<2x256xf32>
    %167 = arith.mulf %162, %166 : vector<2x256xf32>
    %168 = vector.broadcast %21 : f32 to vector<2x256xf32>
    %169 = arith.mulf %168, %165 : vector<2x256xf32>
    %170 = vector.broadcast %70 : f32 to vector<2x256xf32>
    %171 = arith.mulf %170, %167 : vector<2x256xf32>
    %172 = arith.addf %169, %171 : vector<2x256xf32>
    %173 = arith.addf %130, %172 : vector<2x256xf32>
    %174 = vector.broadcast %28 : f32 to vector<2x256xf32>
    %175 = arith.mulf %174, %165 : vector<2x256xf32>
    %176 = vector.broadcast %77 : f32 to vector<2x256xf32>
    %177 = arith.mulf %176, %167 : vector<2x256xf32>
    %178 = arith.addf %175, %177 : vector<2x256xf32>
    %179 = arith.addf %135, %178 : vector<2x256xf32>
    %180 = vector.broadcast %35 : f32 to vector<2x256xf32>
    %181 = arith.mulf %180, %165 : vector<2x256xf32>
    %182 = vector.broadcast %84 : f32 to vector<2x256xf32>
    %183 = arith.mulf %182, %167 : vector<2x256xf32>
    %184 = arith.addf %181, %183 : vector<2x256xf32>
    %185 = arith.addf %140, %184 : vector<2x256xf32>
    %186 = vector.broadcast %42 : f32 to vector<2x256xf32>
    %187 = arith.mulf %186, %165 : vector<2x256xf32>
    %188 = vector.broadcast %91 : f32 to vector<2x256xf32>
    %189 = arith.mulf %188, %167 : vector<2x256xf32>
    %190 = arith.addf %187, %189 : vector<2x256xf32>
    %191 = arith.addf %145, %190 : vector<2x256xf32>
    %192 = vector.broadcast %49 : f32 to vector<2x256xf32>
    %193 = arith.mulf %192, %165 : vector<2x256xf32>
    %194 = vector.broadcast %98 : f32 to vector<2x256xf32>
    %195 = arith.mulf %194, %167 : vector<2x256xf32>
    %196 = arith.addf %193, %195 : vector<2x256xf32>
    %197 = arith.addf %150, %196 : vector<2x256xf32>
    %198 = vector.broadcast %56 : f32 to vector<2x256xf32>
    %199 = arith.mulf %198, %165 : vector<2x256xf32>
    %200 = vector.broadcast %105 : f32 to vector<2x256xf32>
    %201 = arith.mulf %200, %167 : vector<2x256xf32>
    %202 = arith.addf %199, %201 : vector<2x256xf32>
    %203 = arith.addf %155, %202 : vector<2x256xf32>
    %204 = vector.broadcast %63 : f32 to vector<2x256xf32>
    %205 = arith.mulf %204, %165 : vector<2x256xf32>
    %206 = vector.broadcast %112 : f32 to vector<2x256xf32>
    %207 = arith.mulf %206, %167 : vector<2x256xf32>
    %208 = arith.addf %205, %207 : vector<2x256xf32>
    %209 = arith.addf %160, %208 : vector<2x256xf32>
    %c1_i32 = arith.constant 1 : i32
    %210 = tpu.dynamic_rotate %18 by %c1_i32 dim 1 : vector<2x256xf32>, i32 -> vector<2x256xf32>
    %c1_i32_28 = arith.constant 1 : i32
    %211 = tpu.dynamic_rotate %19 by %c1_i32_28 dim 1 : vector<2x256xf32>, i32 -> vector<2x256xf32>
    %c2_29 = arith.constant 2 : index
    %c0_30 = arith.constant 0 : index
    %212 = vector.load %arg2[%c2_29, %c0_30] : memref<16x256xf32, #tpu.memory_space<vmem>>, vector<1x256xf32>
    %213 = vector.broadcast %212 : vector<1x256xf32> to vector<2x256xf32>
    %214 = arith.mulf %210, %213 : vector<2x256xf32>
    %215 = vector.broadcast %212 : vector<1x256xf32> to vector<2x256xf32>
    %216 = arith.mulf %211, %215 : vector<2x256xf32>
    %217 = vector.broadcast %22 : f32 to vector<2x256xf32>
    %218 = arith.mulf %217, %214 : vector<2x256xf32>
    %219 = vector.broadcast %71 : f32 to vector<2x256xf32>
    %220 = arith.mulf %219, %216 : vector<2x256xf32>
    %221 = arith.addf %218, %220 : vector<2x256xf32>
    %222 = arith.addf %173, %221 : vector<2x256xf32>
    %223 = vector.broadcast %29 : f32 to vector<2x256xf32>
    %224 = arith.mulf %223, %214 : vector<2x256xf32>
    %225 = vector.broadcast %78 : f32 to vector<2x256xf32>
    %226 = arith.mulf %225, %216 : vector<2x256xf32>
    %227 = arith.addf %224, %226 : vector<2x256xf32>
    %228 = arith.addf %179, %227 : vector<2x256xf32>
    %229 = vector.broadcast %36 : f32 to vector<2x256xf32>
    %230 = arith.mulf %229, %214 : vector<2x256xf32>
    %231 = vector.broadcast %85 : f32 to vector<2x256xf32>
    %232 = arith.mulf %231, %216 : vector<2x256xf32>
    %233 = arith.addf %230, %232 : vector<2x256xf32>
    %234 = arith.addf %185, %233 : vector<2x256xf32>
    %235 = vector.broadcast %43 : f32 to vector<2x256xf32>
    %236 = arith.mulf %235, %214 : vector<2x256xf32>
    %237 = vector.broadcast %92 : f32 to vector<2x256xf32>
    %238 = arith.mulf %237, %216 : vector<2x256xf32>
    %239 = arith.addf %236, %238 : vector<2x256xf32>
    %240 = arith.addf %191, %239 : vector<2x256xf32>
    %241 = vector.broadcast %50 : f32 to vector<2x256xf32>
    %242 = arith.mulf %241, %214 : vector<2x256xf32>
    %243 = vector.broadcast %99 : f32 to vector<2x256xf32>
    %244 = arith.mulf %243, %216 : vector<2x256xf32>
    %245 = arith.addf %242, %244 : vector<2x256xf32>
    %246 = arith.addf %197, %245 : vector<2x256xf32>
    %247 = vector.broadcast %57 : f32 to vector<2x256xf32>
    %248 = arith.mulf %247, %214 : vector<2x256xf32>
    %249 = vector.broadcast %106 : f32 to vector<2x256xf32>
    %250 = arith.mulf %249, %216 : vector<2x256xf32>
    %251 = arith.addf %248, %250 : vector<2x256xf32>
    %252 = arith.addf %203, %251 : vector<2x256xf32>
    %253 = vector.broadcast %64 : f32 to vector<2x256xf32>
    %254 = arith.mulf %253, %214 : vector<2x256xf32>
    %255 = vector.broadcast %113 : f32 to vector<2x256xf32>
    %256 = arith.mulf %255, %216 : vector<2x256xf32>
    %257 = arith.addf %254, %256 : vector<2x256xf32>
    %258 = arith.addf %209, %257 : vector<2x256xf32>
    %c3_31 = arith.constant 3 : index
    %c0_32 = arith.constant 0 : index
    %259 = vector.load %arg2[%c3_31, %c0_32] : memref<16x256xf32, #tpu.memory_space<vmem>>, vector<1x256xf32>
    %260 = vector.broadcast %259 : vector<1x256xf32> to vector<2x256xf32>
    %261 = arith.mulf %18, %260 : vector<2x256xf32>
    %262 = vector.broadcast %259 : vector<1x256xf32> to vector<2x256xf32>
    %263 = arith.mulf %19, %262 : vector<2x256xf32>
    %264 = vector.broadcast %23 : f32 to vector<2x256xf32>
    %265 = arith.mulf %264, %261 : vector<2x256xf32>
    %266 = vector.broadcast %72 : f32 to vector<2x256xf32>
    %267 = arith.mulf %266, %263 : vector<2x256xf32>
    %268 = arith.addf %265, %267 : vector<2x256xf32>
    %269 = arith.addf %222, %268 : vector<2x256xf32>
    %270 = vector.broadcast %30 : f32 to vector<2x256xf32>
    %271 = arith.mulf %270, %261 : vector<2x256xf32>
    %272 = vector.broadcast %79 : f32 to vector<2x256xf32>
    %273 = arith.mulf %272, %263 : vector<2x256xf32>
    %274 = arith.addf %271, %273 : vector<2x256xf32>
    %275 = arith.addf %228, %274 : vector<2x256xf32>
    %276 = vector.broadcast %37 : f32 to vector<2x256xf32>
    %277 = arith.mulf %276, %261 : vector<2x256xf32>
    %278 = vector.broadcast %86 : f32 to vector<2x256xf32>
    %279 = arith.mulf %278, %263 : vector<2x256xf32>
    %280 = arith.addf %277, %279 : vector<2x256xf32>
    %281 = arith.addf %234, %280 : vector<2x256xf32>
    %282 = vector.broadcast %44 : f32 to vector<2x256xf32>
    %283 = arith.mulf %282, %261 : vector<2x256xf32>
    %284 = vector.broadcast %93 : f32 to vector<2x256xf32>
    %285 = arith.mulf %284, %263 : vector<2x256xf32>
    %286 = arith.addf %283, %285 : vector<2x256xf32>
    %287 = arith.addf %240, %286 : vector<2x256xf32>
    %288 = vector.broadcast %51 : f32 to vector<2x256xf32>
    %289 = arith.mulf %288, %261 : vector<2x256xf32>
    %290 = vector.broadcast %100 : f32 to vector<2x256xf32>
    %291 = arith.mulf %290, %263 : vector<2x256xf32>
    %292 = arith.addf %289, %291 : vector<2x256xf32>
    %293 = arith.addf %246, %292 : vector<2x256xf32>
    %294 = vector.broadcast %58 : f32 to vector<2x256xf32>
    %295 = arith.mulf %294, %261 : vector<2x256xf32>
    %296 = vector.broadcast %107 : f32 to vector<2x256xf32>
    %297 = arith.mulf %296, %263 : vector<2x256xf32>
    %298 = arith.addf %295, %297 : vector<2x256xf32>
    %299 = arith.addf %252, %298 : vector<2x256xf32>
    %300 = vector.broadcast %65 : f32 to vector<2x256xf32>
    %301 = arith.mulf %300, %261 : vector<2x256xf32>
    %302 = vector.broadcast %114 : f32 to vector<2x256xf32>
    %303 = arith.mulf %302, %263 : vector<2x256xf32>
    %304 = arith.addf %301, %303 : vector<2x256xf32>
    %305 = arith.addf %258, %304 : vector<2x256xf32>
    %c255_i32 = arith.constant 255 : i32
    %306 = tpu.dynamic_rotate %18 by %c255_i32 dim 1 : vector<2x256xf32>, i32 -> vector<2x256xf32>
    %c255_i32_33 = arith.constant 255 : i32
    %307 = tpu.dynamic_rotate %19 by %c255_i32_33 dim 1 : vector<2x256xf32>, i32 -> vector<2x256xf32>
    %c4_34 = arith.constant 4 : index
    %c0_35 = arith.constant 0 : index
    %308 = vector.load %arg2[%c4_34, %c0_35] : memref<16x256xf32, #tpu.memory_space<vmem>>, vector<1x256xf32>
    %309 = vector.broadcast %308 : vector<1x256xf32> to vector<2x256xf32>
    %310 = arith.mulf %306, %309 : vector<2x256xf32>
    %311 = vector.broadcast %308 : vector<1x256xf32> to vector<2x256xf32>
    %312 = arith.mulf %307, %311 : vector<2x256xf32>
    %313 = vector.broadcast %24 : f32 to vector<2x256xf32>
    %314 = arith.mulf %313, %310 : vector<2x256xf32>
    %315 = vector.broadcast %73 : f32 to vector<2x256xf32>
    %316 = arith.mulf %315, %312 : vector<2x256xf32>
    %317 = arith.addf %314, %316 : vector<2x256xf32>
    %318 = arith.addf %269, %317 : vector<2x256xf32>
    %319 = vector.broadcast %31 : f32 to vector<2x256xf32>
    %320 = arith.mulf %319, %310 : vector<2x256xf32>
    %321 = vector.broadcast %80 : f32 to vector<2x256xf32>
    %322 = arith.mulf %321, %312 : vector<2x256xf32>
    %323 = arith.addf %320, %322 : vector<2x256xf32>
    %324 = arith.addf %275, %323 : vector<2x256xf32>
    %325 = vector.broadcast %38 : f32 to vector<2x256xf32>
    %326 = arith.mulf %325, %310 : vector<2x256xf32>
    %327 = vector.broadcast %87 : f32 to vector<2x256xf32>
    %328 = arith.mulf %327, %312 : vector<2x256xf32>
    %329 = arith.addf %326, %328 : vector<2x256xf32>
    %330 = arith.addf %281, %329 : vector<2x256xf32>
    %331 = vector.broadcast %45 : f32 to vector<2x256xf32>
    %332 = arith.mulf %331, %310 : vector<2x256xf32>
    %333 = vector.broadcast %94 : f32 to vector<2x256xf32>
    %334 = arith.mulf %333, %312 : vector<2x256xf32>
    %335 = arith.addf %332, %334 : vector<2x256xf32>
    %336 = arith.addf %287, %335 : vector<2x256xf32>
    %337 = vector.broadcast %52 : f32 to vector<2x256xf32>
    %338 = arith.mulf %337, %310 : vector<2x256xf32>
    %339 = vector.broadcast %101 : f32 to vector<2x256xf32>
    %340 = arith.mulf %339, %312 : vector<2x256xf32>
    %341 = arith.addf %338, %340 : vector<2x256xf32>
    %342 = arith.addf %293, %341 : vector<2x256xf32>
    %343 = vector.broadcast %59 : f32 to vector<2x256xf32>
    %344 = arith.mulf %343, %310 : vector<2x256xf32>
    %345 = vector.broadcast %108 : f32 to vector<2x256xf32>
    %346 = arith.mulf %345, %312 : vector<2x256xf32>
    %347 = arith.addf %344, %346 : vector<2x256xf32>
    %348 = arith.addf %299, %347 : vector<2x256xf32>
    %349 = vector.broadcast %66 : f32 to vector<2x256xf32>
    %350 = arith.mulf %349, %310 : vector<2x256xf32>
    %351 = vector.broadcast %115 : f32 to vector<2x256xf32>
    %352 = arith.mulf %351, %312 : vector<2x256xf32>
    %353 = arith.addf %350, %352 : vector<2x256xf32>
    %354 = arith.addf %305, %353 : vector<2x256xf32>
    %c254_i32 = arith.constant 254 : i32
    %355 = tpu.dynamic_rotate %18 by %c254_i32 dim 1 : vector<2x256xf32>, i32 -> vector<2x256xf32>
    %c254_i32_36 = arith.constant 254 : i32
    %356 = tpu.dynamic_rotate %19 by %c254_i32_36 dim 1 : vector<2x256xf32>, i32 -> vector<2x256xf32>
    %c5_37 = arith.constant 5 : index
    %c0_38 = arith.constant 0 : index
    %357 = vector.load %arg2[%c5_37, %c0_38] : memref<16x256xf32, #tpu.memory_space<vmem>>, vector<1x256xf32>
    %358 = vector.broadcast %357 : vector<1x256xf32> to vector<2x256xf32>
    %359 = arith.mulf %355, %358 : vector<2x256xf32>
    %360 = vector.broadcast %357 : vector<1x256xf32> to vector<2x256xf32>
    %361 = arith.mulf %356, %360 : vector<2x256xf32>
    %362 = vector.broadcast %25 : f32 to vector<2x256xf32>
    %363 = arith.mulf %362, %359 : vector<2x256xf32>
    %364 = vector.broadcast %74 : f32 to vector<2x256xf32>
    %365 = arith.mulf %364, %361 : vector<2x256xf32>
    %366 = arith.addf %363, %365 : vector<2x256xf32>
    %367 = arith.addf %318, %366 : vector<2x256xf32>
    %368 = vector.broadcast %32 : f32 to vector<2x256xf32>
    %369 = arith.mulf %368, %359 : vector<2x256xf32>
    %370 = vector.broadcast %81 : f32 to vector<2x256xf32>
    %371 = arith.mulf %370, %361 : vector<2x256xf32>
    %372 = arith.addf %369, %371 : vector<2x256xf32>
    %373 = arith.addf %324, %372 : vector<2x256xf32>
    %374 = vector.broadcast %39 : f32 to vector<2x256xf32>
    %375 = arith.mulf %374, %359 : vector<2x256xf32>
    %376 = vector.broadcast %88 : f32 to vector<2x256xf32>
    %377 = arith.mulf %376, %361 : vector<2x256xf32>
    %378 = arith.addf %375, %377 : vector<2x256xf32>
    %379 = arith.addf %330, %378 : vector<2x256xf32>
    %380 = vector.broadcast %46 : f32 to vector<2x256xf32>
    %381 = arith.mulf %380, %359 : vector<2x256xf32>
    %382 = vector.broadcast %95 : f32 to vector<2x256xf32>
    %383 = arith.mulf %382, %361 : vector<2x256xf32>
    %384 = arith.addf %381, %383 : vector<2x256xf32>
    %385 = arith.addf %336, %384 : vector<2x256xf32>
    %386 = vector.broadcast %53 : f32 to vector<2x256xf32>
    %387 = arith.mulf %386, %359 : vector<2x256xf32>
    %388 = vector.broadcast %102 : f32 to vector<2x256xf32>
    %389 = arith.mulf %388, %361 : vector<2x256xf32>
    %390 = arith.addf %387, %389 : vector<2x256xf32>
    %391 = arith.addf %342, %390 : vector<2x256xf32>
    %392 = vector.broadcast %60 : f32 to vector<2x256xf32>
    %393 = arith.mulf %392, %359 : vector<2x256xf32>
    %394 = vector.broadcast %109 : f32 to vector<2x256xf32>
    %395 = arith.mulf %394, %361 : vector<2x256xf32>
    %396 = arith.addf %393, %395 : vector<2x256xf32>
    %397 = arith.addf %348, %396 : vector<2x256xf32>
    %398 = vector.broadcast %67 : f32 to vector<2x256xf32>
    %399 = arith.mulf %398, %359 : vector<2x256xf32>
    %400 = vector.broadcast %116 : f32 to vector<2x256xf32>
    %401 = arith.mulf %400, %361 : vector<2x256xf32>
    %402 = arith.addf %399, %401 : vector<2x256xf32>
    %403 = arith.addf %354, %402 : vector<2x256xf32>
    %c253_i32 = arith.constant 253 : i32
    %404 = tpu.dynamic_rotate %18 by %c253_i32 dim 1 : vector<2x256xf32>, i32 -> vector<2x256xf32>
    %c253_i32_39 = arith.constant 253 : i32
    %405 = tpu.dynamic_rotate %19 by %c253_i32_39 dim 1 : vector<2x256xf32>, i32 -> vector<2x256xf32>
    %c6_40 = arith.constant 6 : index
    %c0_41 = arith.constant 0 : index
    %406 = vector.load %arg2[%c6_40, %c0_41] : memref<16x256xf32, #tpu.memory_space<vmem>>, vector<1x256xf32>
    %407 = vector.broadcast %406 : vector<1x256xf32> to vector<2x256xf32>
    %408 = arith.mulf %404, %407 : vector<2x256xf32>
    %409 = vector.broadcast %406 : vector<1x256xf32> to vector<2x256xf32>
    %410 = arith.mulf %405, %409 : vector<2x256xf32>
    %411 = vector.broadcast %26 : f32 to vector<2x256xf32>
    %412 = arith.mulf %411, %408 : vector<2x256xf32>
    %413 = vector.broadcast %75 : f32 to vector<2x256xf32>
    %414 = arith.mulf %413, %410 : vector<2x256xf32>
    %415 = arith.addf %412, %414 : vector<2x256xf32>
    %416 = arith.addf %367, %415 : vector<2x256xf32>
    %417 = vector.broadcast %33 : f32 to vector<2x256xf32>
    %418 = arith.mulf %417, %408 : vector<2x256xf32>
    %419 = vector.broadcast %82 : f32 to vector<2x256xf32>
    %420 = arith.mulf %419, %410 : vector<2x256xf32>
    %421 = arith.addf %418, %420 : vector<2x256xf32>
    %422 = arith.addf %373, %421 : vector<2x256xf32>
    %423 = vector.broadcast %40 : f32 to vector<2x256xf32>
    %424 = arith.mulf %423, %408 : vector<2x256xf32>
    %425 = vector.broadcast %89 : f32 to vector<2x256xf32>
    %426 = arith.mulf %425, %410 : vector<2x256xf32>
    %427 = arith.addf %424, %426 : vector<2x256xf32>
    %428 = arith.addf %379, %427 : vector<2x256xf32>
    %429 = vector.broadcast %47 : f32 to vector<2x256xf32>
    %430 = arith.mulf %429, %408 : vector<2x256xf32>
    %431 = vector.broadcast %96 : f32 to vector<2x256xf32>
    %432 = arith.mulf %431, %410 : vector<2x256xf32>
    %433 = arith.addf %430, %432 : vector<2x256xf32>
    %434 = arith.addf %385, %433 : vector<2x256xf32>
    %435 = vector.broadcast %54 : f32 to vector<2x256xf32>
    %436 = arith.mulf %435, %408 : vector<2x256xf32>
    %437 = vector.broadcast %103 : f32 to vector<2x256xf32>
    %438 = arith.mulf %437, %410 : vector<2x256xf32>
    %439 = arith.addf %436, %438 : vector<2x256xf32>
    %440 = arith.addf %391, %439 : vector<2x256xf32>
    %441 = vector.broadcast %61 : f32 to vector<2x256xf32>
    %442 = arith.mulf %441, %408 : vector<2x256xf32>
    %443 = vector.broadcast %110 : f32 to vector<2x256xf32>
    %444 = arith.mulf %443, %410 : vector<2x256xf32>
    %445 = arith.addf %442, %444 : vector<2x256xf32>
    %446 = arith.addf %397, %445 : vector<2x256xf32>
    %447 = vector.broadcast %68 : f32 to vector<2x256xf32>
    %448 = arith.mulf %447, %408 : vector<2x256xf32>
    %449 = vector.broadcast %117 : f32 to vector<2x256xf32>
    %450 = arith.mulf %449, %410 : vector<2x256xf32>
    %451 = arith.addf %448, %450 : vector<2x256xf32>
    %452 = arith.addf %403, %451 : vector<2x256xf32>
    %c48_i32 = arith.constant 48 : i32
    %453 = tpu.dynamic_rotate %416 by %c48_i32 dim 1 : vector<2x256xf32>, i32 -> vector<2x256xf32>
    %c8_42 = arith.constant 8 : index
    %c0_43 = arith.constant 0 : index
    %454 = vector.load %arg2[%c8_42, %c0_43] : memref<16x256xf32, #tpu.memory_space<vmem>>, vector<1x256xf32>
    %455 = vector.broadcast %454 : vector<1x256xf32> to vector<2x256xf32>
    %456 = arith.mulf %453, %455 : vector<2x256xf32>
    %c32_i32 = arith.constant 32 : i32
    %457 = tpu.dynamic_rotate %422 by %c32_i32 dim 1 : vector<2x256xf32>, i32 -> vector<2x256xf32>
    %c9_44 = arith.constant 9 : index
    %c0_45 = arith.constant 0 : index
    %458 = vector.load %arg2[%c9_44, %c0_45] : memref<16x256xf32, #tpu.memory_space<vmem>>, vector<1x256xf32>
    %459 = vector.broadcast %458 : vector<1x256xf32> to vector<2x256xf32>
    %460 = arith.mulf %457, %459 : vector<2x256xf32>
    %461 = arith.addf %456, %460 : vector<2x256xf32>
    %c16_i32 = arith.constant 16 : i32
    %462 = tpu.dynamic_rotate %428 by %c16_i32 dim 1 : vector<2x256xf32>, i32 -> vector<2x256xf32>
    %c10_46 = arith.constant 10 : index
    %c0_47 = arith.constant 0 : index
    %463 = vector.load %arg2[%c10_46, %c0_47] : memref<16x256xf32, #tpu.memory_space<vmem>>, vector<1x256xf32>
    %464 = vector.broadcast %463 : vector<1x256xf32> to vector<2x256xf32>
    %465 = arith.mulf %462, %464 : vector<2x256xf32>
    %466 = arith.addf %461, %465 : vector<2x256xf32>
    %c11_48 = arith.constant 11 : index
    %c0_49 = arith.constant 0 : index
    %467 = vector.load %arg2[%c11_48, %c0_49] : memref<16x256xf32, #tpu.memory_space<vmem>>, vector<1x256xf32>
    %468 = vector.broadcast %467 : vector<1x256xf32> to vector<2x256xf32>
    %469 = arith.mulf %434, %468 : vector<2x256xf32>
    %470 = arith.addf %466, %469 : vector<2x256xf32>
    %c240_i32 = arith.constant 240 : i32
    %471 = tpu.dynamic_rotate %440 by %c240_i32 dim 1 : vector<2x256xf32>, i32 -> vector<2x256xf32>
    %c12_50 = arith.constant 12 : index
    %c0_51 = arith.constant 0 : index
    %472 = vector.load %arg2[%c12_50, %c0_51] : memref<16x256xf32, #tpu.memory_space<vmem>>, vector<1x256xf32>
    %473 = vector.broadcast %472 : vector<1x256xf32> to vector<2x256xf32>
    %474 = arith.mulf %471, %473 : vector<2x256xf32>
    %475 = arith.addf %470, %474 : vector<2x256xf32>
    %c224_i32 = arith.constant 224 : i32
    %476 = tpu.dynamic_rotate %446 by %c224_i32 dim 1 : vector<2x256xf32>, i32 -> vector<2x256xf32>
    %c13_52 = arith.constant 13 : index
    %c0_53 = arith.constant 0 : index
    %477 = vector.load %arg2[%c13_52, %c0_53] : memref<16x256xf32, #tpu.memory_space<vmem>>, vector<1x256xf32>
    %478 = vector.broadcast %477 : vector<1x256xf32> to vector<2x256xf32>
    %479 = arith.mulf %476, %478 : vector<2x256xf32>
    %480 = arith.addf %475, %479 : vector<2x256xf32>
    %c208_i32 = arith.constant 208 : i32
    %481 = tpu.dynamic_rotate %452 by %c208_i32 dim 1 : vector<2x256xf32>, i32 -> vector<2x256xf32>
    %c14_54 = arith.constant 14 : index
    %c0_55 = arith.constant 0 : index
    %482 = vector.load %arg2[%c14_54, %c0_55] : memref<16x256xf32, #tpu.memory_space<vmem>>, vector<1x256xf32>
    %483 = vector.broadcast %482 : vector<1x256xf32> to vector<2x256xf32>
    %484 = arith.mulf %481, %483 : vector<2x256xf32>
    %485 = arith.addf %480, %484 : vector<2x256xf32>
    %486 = vector.broadcast %118 : f32 to vector<2x256xf32>
    %487 = arith.addf %485, %486 : vector<2x256xf32>
    %488 = arith.negf %487 : vector<2x256xf32>
    %489 = math.exp %488 : vector<2x256xf32>
    %cst_56 = arith.constant 1.000000e+00 : f32
    %490 = vector.broadcast %cst_56 : f32 to vector<2x256xf32>
    %491 = arith.addf %490, %489 : vector<2x256xf32>
    %492 = arith.divf %490, %491 : vector<2x256xf32>
    %c0_57 = arith.constant 0 : index
    %c0_58 = arith.constant 0 : index
    %493 = vector.load %arg1[%c0_57, %c0_58] : memref<8x256xf32, #tpu.memory_space<vmem>>, vector<4x256xf32>
    %494 = vector.extract_strided_slice %492 {offsets = [0, 0], sizes = [1, 256], strides = [1, 1]} : vector<2x256xf32> to vector<1x256xf32>
    %495 = vector.broadcast %494 : vector<1x256xf32> to vector<4x256xf32>
    %496 = arith.mulf %493, %495 : vector<4x256xf32>
    %c0_59 = arith.constant 0 : index
    %c0_60 = arith.constant 0 : index
    %497 = vector.load %arg5[%c0_59, %c0_60] : memref<8x256xf32, #tpu.memory_space<vmem>>, vector<4x256xf32>
    tpu.vector_store %arg5[%c0_59, %c0_60], %496 {strides = array<i32>} : memref<8x256xf32, #tpu.memory_space<vmem>>, vector<4x256xf32>,
    %c4_61 = arith.constant 4 : index
    %c0_62 = arith.constant 0 : index
    %498 = vector.load %arg1[%c4_61, %c0_62] : memref<8x256xf32, #tpu.memory_space<vmem>>, vector<4x256xf32>
    %499 = vector.extract_strided_slice %492 {offsets = [1, 0], sizes = [1, 256], strides = [1, 1]} : vector<2x256xf32> to vector<1x256xf32>
    %500 = vector.broadcast %499 : vector<1x256xf32> to vector<4x256xf32>
    %501 = arith.mulf %498, %500 : vector<4x256xf32>
    %c4_63 = arith.constant 4 : index
    %c0_64 = arith.constant 0 : index
    %502 = vector.load %arg5[%c4_63, %c0_64] : memref<8x256xf32, #tpu.memory_space<vmem>>, vector<4x256xf32>
    tpu.vector_store %arg5[%c4_63, %c0_64], %501 {strides = array<i32>} : memref<8x256xf32, #tpu.memory_space<vmem>>, vector<4x256xf32>,
    return
  }
  func.func @transform_0(%arg0: i32) -> (i32, i32) {
    %c0_i32 = arith.constant 0 : i32
    %c0_i32_0 = arith.constant 0 : i32
    return %arg0, %c0_i32 : i32, i32
  }
  func.func @transform_1(%arg0: i32) -> (i32, i32) {
    %c0_i32 = arith.constant 0 : i32
    %c0_i32_0 = arith.constant 0 : i32
    %c0_i32_1 = arith.constant 0 : i32
    return %c0_i32, %c0_i32_0 : i32, i32
  }
  func.func @transform_2(%arg0: i32) -> i32 {
    %c0_i32 = arith.constant 0 : i32
    %c0_i32_0 = arith.constant 0 : i32
    return %c0_i32 : i32
  }
  func.func @transform_3(%arg0: i32) -> i32 {
    %c0_i32 = arith.constant 0 : i32
    %c0_i32_0 = arith.constant 0 : i32
    return %c0_i32 : i32
  }
  func.func @transform_4(%arg0: i32) -> (i32, i32) {
    %c0_i32 = arith.constant 0 : i32
    %c0_i32_0 = arith.constant 0 : i32
    return %arg0, %c0_i32 : i32, i32
  }
}

</mosaic_0001>

<bundles_post_ra>
// kernel: tpu_custom_call.1
= control target key start
LH: loop header
LB: loop body
LE: loop exit
PB: predicated region body
PF: predicated region fallthrough
CT: control target
= control target key end

     0   :  { %s2887_s0 = inlined_call_operand.hbm [shape: f32[8,256], index: 0, kind: input, shape index: {}]   ;;  %s2888_s1 = inlined_call_operand.hbm [shape: f32[16,256], index: 1, kind: input, shape index: {}]   ;;  %s2889_s2 = inlined_call_operand.vmem [shape: f32[98], index: 2, kind: input, shape index: {}]   ;;  %s2890_s3 = inlined_call_operand.<no memory space> [shape: f32[1], index: 3, kind: input, shape index: {}]   ;;  %s2891_s4 = inlined_call_operand.hbm [shape: f32[8,256], index: 4, kind: output, shape index: {}]  }
   0x1   :  { %3018 = sst [smem:[#allocation114_spill]] %s2890_s3 }
   0x2   :  { %3019 = sst [smem:[#allocation115_spill]] %s2891_s4 }
   0x3   :  { %10 = vsyncpa [#allocation6], 0 }
   0x4   :  { %11 = vsyncpa [#allocation10], 0 }
   0x5   :  { %12 = vsyncpa [#allocation8], 0 }
   0x6   :  { %13 = vsyncpa [#allocation7], 0  ;;  %s1502_s15 = smov [#allocation5]   ;;  %s1503_s17 = smov [#allocation9]  }
   0x7   :  { %s20_s16 = sshll.u32 %s1502_s15, 4  ;;  %s29_s18 = sshll.u32 %s1503_s17, 4  ;;  %s21_s16 = int_to_ptr.vmem [resolvable:$true] %s20_s16  ;;  %s1546_s18 = int_to_ptr.vmem [resolvable:$true] %s29_s18 }
   0x8   :  { %s1416_s21 = scalar_lea.hbm %s2887_s0, 256 }
   0x9   :  { %p1417_p0 = scmp.ne.s32.totalorder %s2887_s0, %s1416_s21  ;;  %p1420_p1 = scmp.lt.u32.totalorder %s1416_s21, %s2887_s0 }
   0xb   :  { %p1422_p2 = pnand %p1420_p1, %p1417_p0 }
   0xd   :  { %1425 = shalt.err (!%p1422_p2)
}
   0xe   :  { %s1426_s26 = scalar_lea.vmem %s21_s16, 256  ;;  %p1431_p4 = scmp.lt.s32.totalorder %s21_s16, %s21_s16 }
   0xf   :  { %p1427_p3 = scmp.ne.s32.totalorder %s21_s16, %s1426_s26  ;;  %p1432_p5 = scmp.lt.s32.totalorder %s1426_s26, %s1426_s26 }
  0x11   :  { %p1433_p6 = por %p1432_p5, %p1431_p4 }
  0x13   :  { %p1434_p7 = pnand %p1433_p6, %p1427_p3 }
  0x15   :  { %1437 = shalt.err (!%p1434_p7)
}
  0x16   :  { %23 = dma.hbm_to_vmem [thread:$0]  %s2887_s0, 256, %s21_s16, [#allocation6]  }
  0x17   :  { %s1438_s5 = scalar_lea.hbm %s2888_s1, 512 }
  0x18   :  { %p1439_p8 = scmp.ne.s32.totalorder %s2888_s1, %s1438_s5  ;;  %p1442_p9 = scmp.lt.u32.totalorder %s1438_s5, %s2888_s1 }
  0x1a   :  { %p1444_p10 = pnand %p1442_p9, %p1439_p8 }
  0x1c   :  { %1447 = shalt.err (!%p1444_p10)
}
  0x1d   :  { %s1448_s10 = scalar_lea.vmem %s1546_s18, 512  ;;  %p1453_p12 = scmp.lt.s32.totalorder %s1546_s18, %s1546_s18 }
  0x1e   :  { %p1449_p11 = scmp.ne.s32.totalorder %s1546_s18, %s1448_s10  ;;  %p1454_p13 = scmp.lt.s32.totalorder %s1448_s10, %s1448_s10 }
  0x20   :  { %p1455_p0 = por %p1454_p13, %p1453_p12 }
  0x22   :  { %p1456_p1 = pnand %p1455_p0, %p1449_p11 }
  0x24   :  { %1459 = shalt.err (!%p1456_p1)
}
  0x25   :  { %s1504_s0 = smov 256   ;;  %s2892_s11 = smov 16  }
  0x26   :  { %35 = dma.hbm_to_vmem [thread:$0]  %s2888_s1, 512, %s1546_s18, [#allocation10], %s1504_s0, %s1504_s0, %s2892_s11  }
  0x27   :  { %s42_s16 = sshll.u32 %s2889_s2, 4  ;;  %s43_s16 = int_to_ptr.vmem [resolvable:$true] %s42_s16 }
  0x28   :  { %s1460_s17 = scalar_lea.vmem %s43_s16, 16  ;;  %p1465_p3 = scmp.lt.s32.totalorder %s43_s16, %s43_s16 }
  0x29   :  { %p1461_p2 = scmp.ne.s32.totalorder %s43_s16, %s1460_s17  ;;  %p1466_p4 = scmp.lt.s32.totalorder %s1460_s17, %s1460_s17 }
  0x2b   :  { %p1467_p5 = por %p1466_p4, %p1465_p3 }
  0x2d   :  { %p1468_p6 = pnand %p1467_p5, %p1461_p2 }
  0x2f   :  { %1471 = shalt.err (!%p1468_p6)
}
  0x30   :  { %s1506_s19 = smov [#allocation11]  }
  0x31   :  { %45 = dma.vmem_to_smem %s43_s16, 16, %s1506_s19, [#allocation8]  }
  0x32   :  { %1494 = dma.done.wait [#allocation6], 256  }
  0x33   :  { %1495 = vsyncadd [#allocation6], 4294967040 }
  0x34   :  { %1496 = dma.done.wait [#allocation10], 512  }
  0x35   :  { %1497 = vsyncadd [#allocation10], 4294966784 }
  0x36   :  { %1498 = dma.done.wait [#allocation8], 16  }
  0x37   :  { %1499 = vsyncadd [#allocation8], 4294967280 }
  0x38   :  { %57 = sfence }
  0x39   :  { %v58_v0 = vld [vmem:[#allocation5] sm:$0xf]  ;;  %v59_v1 = vld [vmem:[#allocation5 + $0x8] sm:$0xf]  ;;  %vm60_vm0 = vcmask 1043456   ;;  %vm178_vm1 = vcmask 1047556   ;;  %v84_v9 = vlaneseq }
  0x3a   :  { %v101_v2 = vsel %vm60_vm0, %v58_v0, -inf  ;;  %v108_v3 = vsel %vm60_vm0, %v59_v1, -inf  ;;  %v134_v4 = vld [vmem:[#allocation5] sm:$0xf0]  ;;  %v135_v6 = vld [vmem:[#allocation5 + $0x8] sm:$0xf0] }
  0x3b   :  { %v102_v5 = vrot.slane %v101_v2, 4  ;;  %v109_v7 = vrot.slane %v108_v3, 4  ;;  %v179_v8 = vsel %vm178_vm1, %v134_v4, -inf  ;;  %v186_v12 = vsel %vm178_vm1, %v135_v6, -inf  ;;  %s1509_s1 = smov 2   ;;  %s1510_s2 = smov 3  }
  0x3c   :  { %v180_v11 = vrot.slane %v179_v8, 4  ;;  %v1507_v13 = vmov 1966171168   ;;  %v187_v16 = vrot.slane %v186_v12, 4  ;;  %v1584_v21 = vshrl.u32 %v84_v9, 7  ;;  %s1511_s18 = smov 1  }
  0x3d   :  { %v103_v10 = vmax.f32 %v101_v2, %v102_v5  ;;  %v82_v14 = vunpack.c.l.s4 %v1507_v13  ;;  %v110_v15 = vmax.f32 %v108_v3, %v109_v7  ;;  %v61_v24 = vsel %vm60_vm0, %v58_v0, 0.0  ;;  %s1512_s20 = smov 127   ;;  %s1513_s21 = smov 126  }
  0x3e   :  { %v181_v18 = vmax.f32 %v179_v8, %v180_v11  ;;  %v188_v20 = vmax.f32 %v186_v12, %v187_v16  ;;  %v138_v27 = vrot.slane %v134_v4, 4  ;;  %v62_v31 = vrot.slane %v61_v24, 4  ;;  %s1514_s22 = smov 125   ;;  %s1615_s23 = sld [smem:[#allocation11 + $0x31]] }
  0x3f   :  { %v104_v17 = vrot.slane %v103_v10, 2  ;;  %v111_v19 = vrot.slane %v110_v15, 2  ;;  %v83_v25 = vunpack.c.0.s8 %v82_v14  ;;  %v139_v33 = vrot.slane %v135_v6, 4  ;;  %s1617_s24 = sld [smem:[#allocation11 + $0x38]]  ;;  %s1619_s25 = sld [smem:[#allocation11 + $0x32]] }
  0x40   :  { %v182_v23 = vrot.slane %v181_v18, 2  ;;  %v189_v28 = vrot.slane %v188_v20, 2  ;;  %v68_v35 = vsel %vm60_vm0, %v59_v1, 0.0  ;;  %v63_v38 = vadd.f32 %v62_v31, %v61_v24  ;;  %s1621_s26 = sld [smem:[#allocation11 + $0x39]]  ;;  %s1629_s27 = sld [smem:[#allocation11 + $0x33]] }
  0x41   :  { %v105_v22 = vmax.f32 %v103_v10, %v104_v17  ;;  %v112_v26 = vmax.f32 %v110_v15, %v111_v19  ;;  %v69_v39 = vrot.slane %v68_v35, 4  ;;  %v86_v40 = vsub.s32 %v83_v25, %v1584_v21  ;;  %s1631_s28 = sld [smem:[#allocation11 + $0x3a]]  ;;  %s1633_s29 = sld [smem:[#allocation11 + $0x35]] }
  0x42   :  { %v183_v30 = vmax.f32 %v181_v18, %v182_v23  ;;  %v190_v34 = vmax.f32 %v188_v20, %v189_v28  ;;  %v142_v43 = vsel %vm60_vm0, %v138_v27, 0.0  ;;  %v64_v45 = vrot.slane %v63_v38, 2  ;;  %s1635_s30 = sld [smem:[#allocation11 + $0x3c]]  ;;  %s1639_s5 = sld [smem:[#allocation11 + $0x3f]] }
  0x43   :  { %v106_v29 = vrot.slane %v105_v22, 1  ;;  %v113_v32 = vrot.slane %v112_v26, 1  ;;  %v70_v46 = vadd.f32 %v69_v39, %v68_v35  ;;  %v143_v47 = vrot.slane %v142_v43, 4  ;;  %s1641_s6 = sld [smem:[#allocation11 + $0x40]]  ;;  %s1643_s7 = sld [smem:[#allocation11 + $0x1]] }
  0x44   :  { %v184_v37 = vrot.slane %v183_v30, 1  ;;  %v191_v42 = vrot.slane %v190_v34, 1  ;;  %v149_v50 = vsel %vm60_vm0, %v139_v33, 0.0  ;;  %v65_v51 = vadd.f32 %v64_v45, %v63_v38  ;;  %v624_v33 = vld [vmem:[#allocation9 + $0x3] ss:$8 sm:$0x3] }
  0x45   :  { %v107_v36 = vmax.f32 %v105_v22, %v106_v29  ;;  %v114_v41 = vmax.f32 %v112_v26, %v113_v32  ;;  %v71_v52 = vrot.slane %v70_v46, 2  ;;  %v144_v53 = vadd.f32 %v143_v47, %v142_v43  ;;  %3022 = sst [smem:[#allocation17_spill]] %s1615_s23  ;;  %s1647_s9 = sld [smem:[#allocation11 + $0x41]]  ;;  %v351_v39 = vld [vmem:[#allocation9] ss:$8 sm:$0x3] }
  0x46   :  { %v185_v44 = vmax.f32 %v183_v30, %v184_v37  ;;  %v192_v49 = vmax.f32 %v190_v34, %v191_v42  ;;  %v150_v54 = vrot.slane %v149_v50, 4  ;;  %vm1592_vm2 = vcmp.lt.s32.totalorder %v84_v9, 256  ;;  %3023 = sst [smem:[#allocation18_spill]] %s1617_s24  ;;  %s1645_s8 = sld [smem:[#allocation11 + $0x8]] }
  0x47   :  { %v117_v48 = vcombine.low %v107_v36, %v114_v41  ;;  %v66_v58 = vrot.slane %v65_v51, 1  ;;  %v72_v59 = vadd.f32 %v71_v52, %v70_v46  ;;  %v145_v60 = vrot.slane %v144_v53, 2  ;;  %3024 = sst [smem:[#allocation19_spill]] %s1619_s25  ;;  %s1649_s10 = sld [smem:[#allocation11 + $0x4d]] }
  0x48   :  { %v195_v57 = vcombine.low %v185_v44, %v192_v49  ;;  %v151_v61 = vadd.f32 %v150_v54, %v149_v50  ;;  %v1508_v0 = vmov 1983009808   ;;  %3025 = sst [smem:[#allocation20_spill]] %s1621_s26  ;;  %v1624_v34 = vsub.s32 0, %v1584_v21  ;;  %s1651_s0 = sld [smem:[#allocation11 + $0x2]] }
  0x49   :  { %v124_v56 = vrot.slane %v117_v48, %v86_v40  ;;  %v316_v1 = vunpack.c.l.s4 %v1508_v0  ;;  %v67_v2 = vadd.f32 %v66_v58, %v65_v51  ;;  %v73_v3 = vrot.slane %v72_v59, 1  ;;  %3028 = sst [smem:[#allocation23_spill]] %s1629_s27  ;;  %s1653_s12 = sld [smem:[#allocation11 + $0x9]]  ;;  %v437_v42 = vld [vmem:[#allocation9 + $0x1] ss:$8 sm:$0x3] }
  0x4a   :  { %v202_v63 = vrot.slane %v195_v57, %v86_v40  ;;  %v146_v4 = vadd.f32 %v145_v60, %v144_v53  ;;  %v152_v5 = vrot.slane %v151_v61, 2  ;;  %3026 = vst [vmem:[#allocation21_spill] sm:$0xff] %v1624_v34  ;;  %v1627_v35 = vsub.s32 1, %v1584_v21  ;;  %3029 = sst [smem:[#allocation24_spill]] %s1631_s28  ;;  %s1655_s13 = sld [smem:[#allocation11 + $0x43]] }
  0x4b   :  { %v131_v62 = vrot.slane %v124_v56, %v86_v40  ;;  %v74_v7 = vadd.f32 %v73_v3, %v72_v59  ;;  %v76_v8 = vmul.f32 0.25, %v67_v2  ;;  %v317_v12 = vunpack.c.0.s8 %v316_v1  ;;  %3030 = sst [smem:[#allocation25_spill]] %s1633_s29  ;;  %s1659_s15 = sld [smem:[#allocation11 + $0x3]]  ;;  %v537_v43 = vld [vmem:[#allocation9 + $0x2] ss:$8 sm:$0x3] }
  0x4c   :  { %v209_v6 = vrot.slane %v202_v63, %v86_v40  ;;  %v147_v10 = vrot.slane %v146_v4, 1  ;;  %v153_v11 = vadd.f32 %v152_v5, %v151_v61  ;;  %3027 = vst [vmem:[#allocation22_spill] sm:$0xff] %v1627_v35  ;;  %3031 = sst [smem:[#allocation26_spill]] %s1635_s30  ;;  %v629_v36 = vrot.slane %v624_v33, %v1624_v34  ;;  %s1657_s14 = sld [smem:[#allocation11 + $0x4e]] }
  0x4d   :  { %133 = vst.msk [vmem:[#allocation3] ss:$2 sm:$0x3] %vm1592_vm2, %v131_v62  ;;  %v77_v13 = vmul.f32 0.25, %v74_v7  ;;  %v1601_v19 = vsub.s32 %v317_v12, %v1584_v21  ;;  %v633_v37 = vrot.slane %v624_v33, %v1627_v35  ;;  %3032 = sst [smem:[#allocation27_spill]] %s1639_s5  ;;  %s1661_s16 = sld [smem:[#allocation11 + $0x34]]  ;;  %v1712_v48 = vrot.slane %v351_v39, %v1624_v34 }
  0x4e   :  { %212 = vst.msk [vmem:[#allocation3 + $0x1] ss:$2 sm:$0x3] %vm1592_vm2, %v209_v6  ;;  %v148_v14 = vadd.f32 %v147_v10, %v146_v4  ;;  %v154_v15 = vrot.slane %v153_v11, 1  ;;  %3033 = sst [smem:[#allocation28_spill]] %s1641_s6  ;;  %s1663_s17 = sld [smem:[#allocation11]]  ;;  %v1715_v49 = vrot.slane %v351_v39, %v1627_v35  ;;  %v1730_v53 = vrot.slane %v437_v42, %v1624_v34 }
  0x4f   :  { %v80_v16 = vcombine.low %v76_v8, %v77_v13  ;;  %3034 = sst [smem:[#allocation29_spill]] %s1643_s7  ;;  %v634_v21 = vcombine.low %v629_v36, %v633_v37  ;;  %s1665_s19 = sld [smem:[#allocation11 + $0x4]]  ;;  %v785_v44 = vld [vmem:[#allocation9 + $0x4] ss:$8 sm:$0x3]  ;;  %v1709_v47 = vand.u32 127, %v84_v9  ;;  %v1733_v54 = vrot.slane %v437_v42, %v1627_v35 }
  0x50   :  { %v155_v17 = vadd.f32 %v154_v15, %v153_v11  ;;  %v156_v18 = vmul.f32 0.25, %v148_v14  ;;  %3035 = sst [smem:[#allocation30_spill]] %s1645_s8  ;;  %s1680_s11 = sld [smem:[#allocation11 + $0xc]]  ;;  %v1736_v55 = vrot.slane %v537_v43, %v1624_v34  ;;  %v370_v56 = vstv %s1615_s23  ;;  %v885_v59 = vld [vmem:[#allocation9 + $0x5] ss:$8 sm:$0x3] }
  0x51   :  { %v87_v20 = vrot.slane %v80_v16, %v86_v40  ;;  %3036 = sst [smem:[#allocation31_spill]] %s1647_s9  ;;  %v641_v38 = vrot.slane %v634_v21, %v1601_v19  ;;  %s1682_s4 = sld [smem:[#allocation11 + $0x3d]]  ;;  %v645_v45 = vstv %s1659_s15  ;;  %v1744_v57 = vrot.slane %v537_v43, %v1627_v35  ;;  %v985_v6 = vld [vmem:[#allocation9 + $0x6] ss:$8 sm:$0x3] }
  0x52   :  { %v157_v22 = vmul.f32 0.25, %v155_v17  ;;  %3037 = sst [smem:[#allocation32_spill]] %s1649_s10  ;;  %s1684_s3 = sld [smem:[#allocation11 + $0xf]]  ;;  %v1747_v58 = vrot.slane %v785_v44, %v1624_v34  ;;  %v456_v60 = vstv %s1619_s25  ;;  %v378_v61 = vstv %s1617_s24 }
  0x53   :  { %v94_v24 = vrot.slane %v87_v20, %v86_v40  ;;  %3038 = sst [smem:[#allocation33_spill]] %s1651_s0  ;;  %v647_v46 = vstv %s1661_s16  ;;  %s1717_s15 = sld [smem:[#allocation11 + $0x37]]  ;;  %v1756_v62 = vrot.slane %v785_v44, %v1627_v35  ;;  %v556_v63 = vstv %s1629_s27 }
  0x54   :  { %v160_v25 = vcombine.low %v156_v18, %v157_v22  ;;  %3039 = sst [smem:[#allocation34_spill]] %s1653_s12  ;;  %s1719_s16 = sld [smem:[#allocation11 + $0x54]]  ;;  %v466_v4 = vstv %s1621_s26  ;;  %v566_v5 = vstv %s1631_s28  ;;  %v386_v8 = vstv %s1639_s5 }
  0x55   :  { %v1603_v23 = vld [vmem:[#allocation3] sm:$0xf]  ;;  %100 = vst.msk [vmem:[#allocation2] ss:$2 sm:$0x3] %vm1592_vm2, %v94_v24  ;;  %3040 = sst [smem:[#allocation35_spill]] %s1655_s13  ;;  %v476_v15 = vstv %s1641_s6  ;;  %v1789_v16 = vrot.slane %v885_v59, %v1624_v34  ;;  %v402_v20 = vstv %s1649_s10  ;;  %v1798_v22 = vrot.slane %v885_v59, %v1627_v35 }
  0x56   :  { %v341_v26 = vrot.slane %v1603_v23, %v1601_v19  ;;  %v167_v27 = vrot.slane %v160_v25, %v86_v40  ;;  %3041 = sst [smem:[#allocation36_spill]] %s1657_s14  ;;  %s1686_s14 = sld [smem:[#allocation11 + $0x4f]]  ;;  %vm331_vm3 = vcmp.lt.s32.totalorder %v1709_v47, 3  ;;  %vm427_vm4 = vcmp.lt.s32.totalorder %v1709_v47, 2 }
  0x57   :  { %3042 = sst [smem:[#allocation37_spill]] %s1663_s17  ;;  %s1694_s13 = sld [smem:[#allocation11 + $0x6]]  ;;  %vm527_vm5 = vcmp.lt.s32.totalorder %v1709_v47, 1  ;;  %vm775_vm6 = vcmp.lt.s32.totalorder %v1709_v47, 127  ;;  %vm875_vm7 = vcmp.lt.s32.totalorder %v1709_v47, 126  ;;  %vm975_vm8 = vcmp.lt.s32.totalorder %v1709_v47, 125 }
  0x58   :  { %430 = vrot.lane.b32.xlu0 %v341_v26, %s1509_s1  ;;  %345 = vrot.lane.b32.xlu1 %v341_v26, %s1510_s2  ;;  %v342_v28 = vcombine.high %v341_v26, %v341_v26  ;;  %v174_v29 = vrot.slane %v167_v27, %v86_v40  ;;  %3043 = sst [smem:[#allocation38_spill]] %s1665_s19  ;;  %v1689_v40 = vmul.f32 %v641_v38, %v1603_v23  ;;  %s1761_s23 = sld [smem:[#allocation11 + $0x1f]]  ;;  %vm1097_vm9 = vcmp.lt.s32.totalorder %v1709_v47, 32 }
  0x59   :  { %3048 = sst [smem:[#allocation43_spill]] %s1680_s11  ;;  %s1768_s24 = sld [smem:[#allocation11 + $0x44]]  ;;  %vm1075_vm10 = vcmp.lt.s32.totalorder %v1709_v47, 48  ;;  %vm1121_vm11 = vcmp.lt.s32.totalorder %v1709_v47, 16  ;;  %vm1162_vm12 = vcmp.lt.s32.totalorder %v1709_v47, 112  ;;  %vm1186_vm13 = vcmp.lt.s32.totalorder %v1709_v47, 96 }
  0x5a   :  { %177 = vst.msk [vmem:[#allocation2 + $0x1] ss:$2 sm:$0x3] %vm1592_vm2, %v174_v29  ;;  %3049 = sst [smem:[#allocation44_spill]] %s1682_s4  ;;  %s1704_s4 = sld [smem:[#allocation11 + $0xd]]  ;;  %v648_v51 = vmul.f32 %v647_v46, %v1689_v40  ;;  %vm1210_vm14 = vcmp.lt.s32.totalorder %v1709_v47, 80 }
  0x5b   :  { %3050 = sst [smem:[#allocation45_spill]] %s1684_s3  ;;  %s1700_s3 = sld [smem:[#allocation11 + $0x11]] }
  0x5c   :  { %530 = vrot.lane.b32.xlu0 %v341_v26, %s1511_s18  ;;  %347 = vrot.lane.b32.xlu1 %v342_v28, %s1510_s2  ;;  %3051 = sst [smem:[#allocation46_spill]] %s1686_s14  ;;  %s1702_s14 = sld [smem:[#allocation11 + $0x42]] }
  0x5d   :  { %3052 = sst [smem:[#allocation47_spill]] %s1694_s13  ;;  %s1706_s11 = sld [smem:[#allocation11 + $0x10]] }
  0x5e   :  { %3056 = sst [smem:[#allocation51_spill]] %s1717_s15  ;;  %s1776_s27 = sld [smem:[#allocation11 + $0x56]]  ;;  %v717_v21 = vstv %s1761_s23 }
  0x5f   :  { %3057 = sst [smem:[#allocation52_spill]] %s1719_s16  ;;  %s1741_s16 = sld [smem:[#allocation11 + $0x1d]] }
  0x60   :  { %778 = vrot.lane.b32.xlu0 %v341_v26, %s1512_s20  ;;  %432 = vrot.lane.b32.xlu1 %v342_v28, %s1509_s1  ;;  %3054 = sst [smem:[#allocation49_spill]] %s1704_s4  ;;  %s1739_s4 = sld [smem:[#allocation11 + $0x12]] }
  0x61   :  { %v1611_v30 = vld [vmem:[#allocation2] sm:$0xf]  ;;  %s1763_s25 = sld [smem:[#allocation11 + $0x50]]  ;;  %v681_v10 = vstv %s1700_s3  ;;  %s1783_s29 = sld [smem:[#allocation11 + $0x14]] }
  0x62   :  { %v321_v31 = vrot.slane %v1611_v30, %v1601_v19  ;;  %v1692_v41 = vmul.f32 %v641_v38, %v1611_v30  ;;  %3064 = sst [smem:[#allocation59_spill]] %s1768_s24  ;;  %v683_v11 = vstv %s1702_s14  ;;  %s1786_s28 = sld [smem:[#allocation11 + $0x1c]]  ;;  %v1818_v30 = vrot.slane %v985_v6, %v1624_v34 }
  0x63   :  { %3055 = sst [smem:[#allocation50_spill]] %s1706_s11  ;;  %s1727_s11 = sld [smem:[#allocation11 + $0xe]]  ;;  %v684_v25 = vmul.f32 %v683_v11, %v1689_v40 }
  0x64   :  { %532 = vrot.lane.b32.xlu1 %v342_v28, %s1511_s18  ;;  %325 = vrot.lane.b32.xlu0 %v321_v31, %s1510_s2  ;;  %v322_v32 = vcombine.high %v321_v31, %v321_v31  ;;  %v646_v50 = vmul.f32 %v645_v45, %v1692_v41  ;;  %3066 = sst [smem:[#allocation61_spill]] %s1776_s27  ;;  %s1792_s3 = sld [smem:[#allocation11 + $0x20]]  ;;  %v682_v24 = vmul.f32 %v681_v10, %v1692_v41 }
  0x65   :  { %3061 = sst [smem:[#allocation56_spill]] %s1741_s16  ;;  %s1795_s14 = sld [smem:[#allocation11 + $0x58]] }
  0x66   :  { %3060 = sst [smem:[#allocation55_spill]] %s1739_s4  ;;  %v649_v2 = vadd.f32 %v648_v51, %v646_v50  ;;  %s1805_s8 = sld [smem:[#allocation11 + $0x26]]  ;;  %v685_v43 = vadd.f32 %v684_v25, %v682_v24 }
  0x67   :  { %3067 = sst [smem:[#allocation62_spill]] %s1783_s29  ;;  %s1807_s7 = sld [smem:[#allocation11 + $0x57]]  ;;  %v719_v38 = vstv %s1763_s25 }
  0x68   :  { %780 = vrot.lane.b32.xlu1 %v342_v28, %s1512_s20  ;;  %423 = vrot.lane.b32.xlu0 %v321_v31, %s1509_s1  ;;  %3068 = sst [smem:[#allocation63_spill]] %s1786_s28  ;;  %v1801_v23 = vrot.slane %v649_v2, %v1601_v19  ;;  %s1813_s30 = sld [smem:[#allocation11 + $0x45]]  ;;  %v720_v59 = vmul.f32 %v719_v38, %v1689_v40 }
  0x69   :  { %3059 = sst [smem:[#allocation54_spill]] %s1727_s11  ;;  %s1815_s9 = sld [smem:[#allocation11 + $0x21]] }
  0x6a   :  { %3069 = sst [smem:[#allocation64_spill]] %s1792_s3  ;;  %s1825_s17 = sld [smem:[#allocation11 + $0x52]] }
  0x6b   :  { %3070 = sst [smem:[#allocation65_spill]] %s1795_s14  ;;  %s1827_s19 = sld [smem:[#allocation11 + $0x5c]] }
  0x6c   :  { %880 = vrot.lane.b32.xlu1 %v342_v28, %s1513_s21  ;;  %523 = vrot.lane.b32.xlu0 %v321_v31, %s1511_s18  ;;  %s3079_s12 = sld [smem:[#allocation36_spill]]  ;;  %s1835_s5 = sld [smem:[#allocation11 + $0x2d]]  ;;  %v735_v24 = vstv %s1805_s8 }
  0x6d   :  { %s1851_s25 = sld [smem:[#allocation11 + $0x18]]  ;;  %s1853_s0 = sld [smem:[#allocation11 + $0x49]]  ;;  %v737_v25 = vstv %s1807_s7 }
  0x6e   :  { %3072 = sst [smem:[#allocation66_spill]] %s1813_s30  ;;  %s1845_s30 = sld [smem:[#allocation11 + $0x5d]] }
  0x6f   :  { %3073 = sst [smem:[#allocation67_spill]] %s1815_s9  ;;  %s1837_s9 = sld [smem:[#allocation11 + $0x5e]] }
  0x70   :  { %425 = vrot.lane.b32.xlu1 %v322_v32, %s1509_s1  ;;  %771 = vrot.lane.b32.xlu0 %v321_v31, %s1512_s20  ;;  %s1667_s1 = sld [smem:[#allocation11 + $0x7]]  ;;  %3077 = sst [smem:[#allocation68_spill]] %s1825_s17 }
  0x71   :  { %s1843_s17 = sld [smem:[#allocation11 + $0x22]]  ;;  %s1858_s13 = sld [smem:[#allocation11 + $0x24]]  ;;  %v516_v45 = vstv %s1827_s19 }
  0x72   :  { %v496_v51 = vstv %s3079_s12  ;;  %s1861_s10 = sld [smem:[#allocation11 + $0x46]]  ;;  %s1870_s12 = sld [smem:[#allocation11 + $0x5f]] }
  0x73   :  { %s1888_s11 = sld [smem:[#allocation11 + $0x27]]  ;;  %s1892_s8 = sld [smem:[#allocation11 + $0x2b]] }
  0x74   :  { %525 = vrot.lane.b32.xlu1 %v322_v32, %s1511_s18  ;;  %871 = vrot.lane.b32.xlu0 %v321_v31, %s1513_s21  ;;  %s1672_s18 = sld [smem:[#allocation11 + $0xb]]  ;;  %s1895_s7 = sld [smem:[#allocation11 + $0x48]] }
  0x75   :  { %s1898_s16 = sld [smem:[#allocation11 + $0x28]]  ;;  %s1900_s4 = sld [smem:[#allocation11 + $0x59]] }
  0x76   :  { %3044 = sst [smem:[#allocation39_spill]] %s1667_s1  ;;  %s1867_s1 = sld [smem:[#allocation11 + $0x53]] }
  0x77   :  { %3082 = sst [smem:[#allocation69_spill]] %s1843_s17  ;;  %s1880_s17 = sld [smem:[#allocation11 + $0x47]] }
  0x78   :  { %773 = vrot.lane.b32.xlu1 %v322_v32, %s1512_s20  ;;  %327 = vrot.lane.b32.xlu0 %v322_v32, %s1510_s2  ;;  %s1669_s2 = sld [smem:[#allocation11 + $0xa]]  ;;  %s1674_s20 = sld [smem:[#allocation11 + $0x3b]] }
  0x79   :  { %3085 = sst [smem:[#allocation70_spill]] %s1858_s13  ;;  %s1913_s3 = sld [smem:[#allocation11 + $0x4a]] }
  0x7a   :  { %3045 = sst [smem:[#allocation40_spill]] %s1672_s18  ;;  %s1696_s18 = sld [smem:[#allocation11 + $0x51]] }
  0x7b   :  { %3086 = sst [smem:[#allocation71_spill]] %s1861_s10  ;;  %s1916_s26 = sld [smem:[#allocation11 + $0x29]] }
  0x7c   :  { %873 = vrot.lane.b32.xlu1 %v322_v32, %s1513_s21  ;;  %878 = vrot.lane.b32.xlu0 %v341_v26, %s1513_s21  ;;  %s1676_s21 = sld [smem:[#allocation11 + $0x5]]  ;;  %s1919_s23 = sld [smem:[#allocation11 + $0x2a]] }
  0x7d   :  { %3089 = sst [smem:[#allocation72_spill]] %s1867_s1  ;;  %s1927_s28 = sld [smem:[#allocation11 + $0x2e]] }
  0x7e   :  { %v663_v9 = vstv %s1669_s2  ;;  %v665_v52 = vstv %s1674_s20  ;;  %s1751_s2 = sld [smem:[#allocation11 + $0x13]]  ;;  %s1753_s20 = sld [smem:[#allocation11 + $0x55]] }
  0x7f   :  { %v664_v0 = vmul.f32 %v663_v9, %v1692_v41  ;;  %v666_v1 = vmul.f32 %v665_v52, %v1689_v40  ;;  %v718_v52 = vmul.f32 %v717_v21, %v1692_v41  ;;  %3093 = sst [smem:[#allocation73_spill]] %s1913_s3  ;;  %s3096_s29 = sld [smem:[#allocation67_spill]] }
  0x80   :  { %973 = vrot.lane.b32.xlu1 %v322_v32, %s1514_s22  ;;  %971 = vrot.lane.b32.xlu0 %v321_v31, %s1514_s22  ;;  %3053 = sst [smem:[#allocation48_spill]] %s1696_s18  ;;  %s1723_s18 = sld [smem:[#allocation11 + $0x3e]]  ;;  %v1821_v31 = vrot.slane %v985_v6, %v1627_v35 }
  0x81   :  { %v667_v17 = vadd.f32 %v666_v1, %v664_v0  ;;  %v721_v11 = vadd.f32 %v720_v59, %v718_v52  ;;  %v736_v1 = vmul.f32 %v735_v24, %v1692_v41  ;;  %v738_v52 = vmul.f32 %v737_v25, %v1689_v40  ;;  %s3097_s24 = sld [smem:[#allocation68_spill]]  ;;  %s1942_s14 = sld [smem:[#allocation11 + $0x60]] }
  0x82   :  { %3046 = sst [smem:[#allocation41_spill]] %s1676_s21  ;;  %s1886_s21 = sld [smem:[#allocation11 + $0x23]]  ;;  %v753_v59 = vstv %s1835_s5  ;;  %v699_v25 = vstv %s1851_s25 }
  0x83   :  { %v1830_v36 = vrot.slane %v667_v17, %v1601_v19  ;;  %v1874_v17 = vrot.slane %v685_v43, %v1601_v19  ;;  %v755_v43 = vstv %s1837_s9  ;;  %s1925_s9 = sld [smem:[#allocation11 + $0x5a]]  ;;  %3095 = sst [smem:[#allocation74_spill]] %s1927_s28  ;;  %v754_v21 = vmul.f32 %v753_v59, %v1692_v41 }
  0x84   :  { %980 = vrot.lane.b32.xlu1 %v342_v28, %s1514_s22  ;;  %978 = vrot.lane.b32.xlu0 %v341_v26, %s1514_s22  ;;  %s1678_s22 = sld [smem:[#allocation11 + $0x36]]  ;;  %3063 = sst [smem:[#allocation58_spill]] %s1753_s20  ;;  %v701_v28 = vstv %s1853_s0  ;;  %v756_v39 = vmul.f32 %v755_v43, %v1689_v40  ;;  %v1934_v37 = vrot.slane %v721_v11, %v1601_v19  ;;  %v739_v38 = vadd.f32 %v738_v52, %v736_v1 }
  0x85   :  { %3062 = sst [smem:[#allocation57_spill]] %s1751_s2  ;;  %s1778_s2 = sld [smem:[#allocation11 + $0x5b]]  ;;  %v700_v43 = vmul.f32 %v699_v25, %v1692_v41  ;;  %v702_v1 = vmul.f32 %v701_v28, %v1689_v40 }
  0x86   :  { %3058 = sst [smem:[#allocation53_spill]] %s1723_s18  ;;  %s1770_s20 = sld [smem:[#allocation11 + $0x1e]]  ;;  %3098 = vst [vmem:[#allocation75_spill] sm:$0xff] %v1934_v37  ;;  %v757_v41 = vadd.f32 %v756_v39, %v754_v21  ;;  %v1969_v25 = vrot.slane %v739_v38, %v1601_v19 }
  0x87   :  { %s3090_s6 = sld [smem:[#allocation58_spill]]  ;;  %s1911_s18 = sld [smem:[#allocation11 + $0x2c]]  ;;  %v703_v28 = vadd.f32 %v702_v1, %v700_v43 }
  0x88   :  { %3091 = sst [smem:[#allocation58_spill]] %s1886_s21  ;;  %s1951_s13 = sld [smem:[#allocation11 + $0x30]]  ;;  %3104 = vst [vmem:[#allocation78_spill] sm:$0xff] %v1969_v25  ;;  %v1992_v50 = vrot.slane %v757_v41, %v1601_v19 }
  0x89   :  { %s1937_s0 = sld [smem:[#allocation11 + $0x2f]]  ;;  %3102 = sst [smem:[#allocation76_spill]] %s1942_s14  ;;  %v2003_v41 = vrot.slane %v703_v28, %v1601_v19 }
  0x8a   :  { %3047 = sst [smem:[#allocation42_spill]] %s1678_s22  ;;  %s3080_s22 = sld [smem:[#allocation52_spill]]  ;;  %3105 = vst [vmem:[#allocation79_spill] sm:$0xff] %v1992_v50 }
  0x8b   :  { %v418_v46 = vstv %s1778_s2  ;;  %s1944_s15 = sld [smem:[#allocation11 + $0x17]]  ;;  %s1955_s27 = sld [smem:[#allocation11 + $0x15]]  ;;  %3106 = vst [vmem:[#allocation80_spill] sm:$0xff] %v2003_v41 }
  0x8c   :  { %3065 = sst [smem:[#allocation60_spill]] %s1770_s20  ;;  %s1939_s20 = sld [smem:[#allocation11 + $0x16]] }
  0x8d   :  { %v506_v9 = vstv %s3090_s6  ;;  %s1960_s5 = sld [smem:[#allocation11 + $0x61]]  ;;  %s1972_s21 = sld [smem:[#allocation11 + $0x1a]] }
  0x8e   :  { %s1962_s10 = sld [smem:[#allocation11 + $0x19]]  ;;  %s1974_s1 = sld [smem:[#allocation11 + $0x4b]] }
  0x8f   :  { %3099 = sst [smem:[#allocation67_spill]] %s1937_s0  ;;  %s1978_s25 = sld [smem:[#allocation11 + $0x1b]] }
  0x90   :  { %v410_v0 = vstv %s3080_s22  ;;  %s1876_s22 = sld [smem:[#allocation11 + $0x25]]  ;;  %s3127_s2 = sld [smem:[#allocation31_spill]] }
  0x91   :  { %3103 = sst [smem:[#allocation77_spill]] %s1944_s15  ;;  %s3129_s0 = sld [smem:[#allocation46_spill]] }
  0x92   :  { %3101 = sst [smem:[#allocation68_spill]] %s1939_s20  ;;  %s3132_s20 = sld [smem:[#allocation61_spill]] }
  0x93   :  { %s3137_s6 = sld [smem:[#allocation25_spill]]  ;;  %s3139_s3 = sld [smem:[#allocation26_spill]] }
  0x94   :  { %s3142_s19 = sld [smem:[#allocation35_spill]]  ;;  %s3152_s14 = sld [smem:[#allocation48_spill]] }
  0x95   :  { %s3156_s28 = sld [smem:[#allocation65_spill]]  ;;  %s3162_s15 = sld [smem:[#allocation30_spill]] }
  0x96   :  { %v3140_v35 = vstv %s3127_s2  ;;  %s3166_s2 = sld [smem:[#allocation45_spill]] }
  0x97   :  { %v3141_v41 = vmov %v3140_v35 }
  0xca   :  { %v431_v26 = vpop.permute.xlu0 %430  ;;  %v346_v59 = vpop.permute.xlu1 %345 }
  0xce   :  { %v531_v39 = vpop.permute.xlu0 %530  ;;  %v348_v21 = vpop.permute.xlu1 %347 }
  0xcf   :  { %v349_v11 = vsel %vm331_vm3, %v346_v59, %v348_v21  ;;  %v350_v29 = vsel %vm331_vm3, %v348_v21, %v346_v59 }
  0xd0   :  { %v2006_v40 = vmul.f32 %v1712_v48, %v350_v29  ;;  %v2009_v43 = vmul.f32 %v1715_v49, %v349_v11 }
  0xd2   :  { %v779_v13 = vpop.permute.xlu0 %778  ;;  %v433_v59 = vpop.permute.xlu1 %432  ;;  %v2038_v1 = vmul.f32 %v370_v56, %v2009_v43  ;;  %v2053_v28 = vmul.f32 %v378_v61, %v2006_v40  ;;  %v2062_v38 = vmul.f32 %v386_v8, %v2009_v43  ;;  %v2077_v19 = vmul.f32 %v402_v20, %v2006_v40 }
  0xd3   :  { %v434_v52 = vsel %vm427_vm4, %v431_v26, %v433_v59  ;;  %v435_v32 = vsel %vm427_vm4, %v433_v59, %v431_v26  ;;  %v2102_v12 = vmul.f32 %v418_v46, %v2009_v43 }
  0xd4   :  { %v2025_v14 = vmul.f32 %v1730_v53, %v435_v32  ;;  %v2028_v26 = vmul.f32 %v1733_v54, %v434_v52  ;;  %v2043_v32 = vmul.f32 %v370_v56, %v2006_v40  ;;  %v2048_v52 = vmul.f32 %v378_v61, %v2009_v43  ;;  %3117 = vst [vmem:[#allocation83_spill] sm:$0xff] %v2077_v19 }
  0xd5   :  { %v2067_v56 = vmul.f32 %v386_v8, %v2006_v40  ;;  %v2072_v61 = vmul.f32 %v402_v20, %v2009_v43  ;;  %v2087_v8 = vmul.f32 %v410_v0, %v2006_v40  ;;  %3121 = vst [vmem:[#allocation86_spill] sm:$0xff] %v2102_v12 }
  0xd6   :  { %3112 = vst [vmem:[#allocation81_spill] sm:$0xff] %v2028_v26  ;;  %v533_v59 = vpop.permute.xlu1 %532  ;;  %v2033_v11 = vpop.permute.xlu0 %325  ;;  %v2092_v29 = vmul.f32 %v456_v60, %v2028_v26  ;;  %v2097_v20 = vmul.f32 %v456_v60, %v2025_v14  ;;  %v2150_v7 = vmul.f32 %v506_v9, %v2028_v26  ;;  %v2168_v42 = vmul.f32 %v516_v45, %v2028_v26 }
  0xd7   :  { %v534_v27 = vsel %vm527_vm5, %v531_v39, %v533_v59  ;;  %v535_v21 = vsel %vm527_vm5, %v533_v59, %v531_v39  ;;  %3115 = vst [vmem:[#allocation82_spill] sm:$0xff] %v2072_v61  ;;  %v2082_v39 = vmul.f32 %v410_v0, %v2009_v43  ;;  %3120 = vst [vmem:[#allocation85_spill] sm:$0xff] %v2087_v8  ;;  %v3157_v8 = vstv %s3137_s6  ;;  %s3196_s6 = sld [smem:[#allocation50_spill]] }
  0xd8   :  { %v2107_v0 = vmul.f32 %v418_v46, %v2006_v40  ;;  %v2110_v6 = vmul.f32 %v1736_v55, %v535_v21  ;;  %v2113_v24 = vmul.f32 %v1744_v57, %v534_v27  ;;  %v468_v46 = vmul.f32 %v466_v4, %v2028_v26  ;;  %3131 = vst [vmem:[#allocation92_spill] sm:$0xff] %v2150_v7 }
  0xd9   :  { %3118 = vst [vmem:[#allocation84_spill] sm:$0xff] %v2082_v39  ;;  %v2125_v21 = vmul.f32 %v466_v4, %v2025_v14  ;;  %v2130_v27 = vmul.f32 %v476_v15, %v2028_v26  ;;  %v2145_v4 = vmul.f32 %v496_v51, %v2025_v14  ;;  %3136 = vst [vmem:[#allocation96_spill] sm:$0xff] %v2168_v42 }
  0xda   :  { %v781_v59 = vpop.permute.xlu1 %780  ;;  %3122 = vst [vmem:[#allocation87_spill] sm:$0xff] %v2107_v0  ;;  %3123 = vst [vmem:[#allocation88_spill] sm:$0xff] %v2110_v6  ;;  %v424_v44 = vpop.permute.xlu0 %423  ;;  %v2188_v18 = vmul.f32 %v566_v5, %v2113_v24  ;;  %v2198_v34 = vmul.f32 %v3140_v35, %v2113_v24  ;;  %v2203_v50 = vmul.f32 %v3141_v41, %v2110_v6  ;;  %v3151_v41 = vstv %s1845_s30  ;;  %s3161_s30 = sld [smem:[#allocation29_spill]] }
  0xdb   :  { %3124 = vst [vmem:[#allocation89_spill] sm:$0xff] %v2113_v24  ;;  %v782_v60 = vsel %vm775_vm6, %v779_v13, %v781_v59  ;;  %v783_v2 = vsel %vm775_vm6, %v781_v59, %v779_v13  ;;  %v2135_v13 = vmul.f32 %v476_v15, %v2025_v14  ;;  %v2140_v59 = vmul.f32 %v496_v51, %v2028_v26 }
  0xdc   :  { %3130 = vst [vmem:[#allocation91_spill] sm:$0xff] %v2145_v4  ;;  %v2155_v15 = vmul.f32 %v506_v9, %v2025_v14  ;;  %v2158_v3 = vmul.f32 %v1747_v58, %v782_v60  ;;  %v2161_v33 = vmul.f32 %v1756_v62, %v783_v2  ;;  %v2173_v9 = vmul.f32 %v516_v45, %v2025_v14 }
  0xdd   :  { %3128 = vst [vmem:[#allocation90_spill] sm:$0xff] %v2140_v59  ;;  %v2178_v60 = vmul.f32 %v556_v63, %v2113_v24  ;;  %v2183_v2 = vmul.f32 %v556_v63, %v2110_v6  ;;  %v2193_v45 = vmul.f32 %v566_v5, %v2110_v6  ;;  %v3143_v63 = vstv %s3129_s0  ;;  %s3174_s0 = sld [smem:[#allocation71_spill]] }
  0xde   :  { %3133 = vst [vmem:[#allocation93_spill] sm:$0xff] %v2155_v15  ;;  %3134 = vst [vmem:[#allocation94_spill] sm:$0xff] %v2158_v3  ;;  %v2163_v51 = vpop.permute.xlu1 %880  ;;  %v524_v10 = vpop.permute.xlu0 %523  ;;  %v3145_v0 = vmov %v3143_v63  ;;  %v3147_v5 = vstv %s3132_s20  ;;  %v2228_v25 = vmul.f32 %v3151_v41, %v2113_v24  ;;  %s3184_s20 = sld [smem:[#allocation33_spill]] }
  0xdf   :  { %3135 = vst [vmem:[#allocation95_spill] sm:$0xff] %v2161_v33  ;;  %3138 = vst [vmem:[#allocation97_spill] sm:$0xff] %v2173_v9  ;;  %v2208_v9 = vmul.f32 %v3143_v63, %v2113_v24  ;;  %v2213_v42 = vmul.f32 %v3145_v0, %v2110_v6  ;;  %v2218_v26 = vmul.f32 %v3147_v5, %v2113_v24  ;;  %v3149_v35 = vmov %v3147_v5 }
  0xe0   :  { %v2223_v12 = vmul.f32 %v3149_v35, %v2110_v6  ;;  %3153 = vst [vmem:[#allocation102_spill] sm:$0xff] %v2228_v25  ;;  %v3154_v63 = vmov %v3151_v41  ;;  %v2238_v5 = vmul.f32 %v3157_v8, %v2161_v33  ;;  %v3158_v35 = vmov %v3157_v8 }
  0xe1   :  { %3144 = vst [vmem:[#allocation98_spill] sm:$0xff] %v2208_v9  ;;  %3146 = vst [vmem:[#allocation99_spill] sm:$0xff] %v2213_v42  ;;  %v2233_v15 = vmul.f32 %v3154_v63, %v2110_v6  ;;  %v3159_v41 = vstv %s3139_s3  ;;  %v3163_v6 = vstv %s3142_s19  ;;  %s3197_s3 = sld [smem:[#allocation38_spill]]  ;;  %s3199_s19 = sld [smem:[#allocation37_spill]] }
  0xe2   :  { %3148 = vst [vmem:[#allocation100_spill] sm:$0xff] %v2218_v26  ;;  %3150 = vst [vmem:[#allocation101_spill] sm:$0xff] %v2223_v12  ;;  %v426_v0 = vpop.permute.xlu1 %425  ;;  %v2243_v12 = vmul.f32 %v3158_v35, %v2158_v3  ;;  %v2248_v24 = vmul.f32 %v3159_v41, %v2161_v33  ;;  %v3160_v63 = vmov %v3159_v41  ;;  %v772_v25 = vpop.permute.xlu0 %771  ;;  %v2262_v26 = vmul.f32 %v3163_v6, %v2161_v33 }
  0xe3   :  { %3155 = vst [vmem:[#allocation103_spill] sm:$0xff] %v2233_v15  ;;  %v2253_v15 = vmul.f32 %v3160_v63, %v2158_v3  ;;  %v428_v8 = vsel %vm427_vm4, %v424_v44, %v426_v0  ;;  %v429_v35 = vsel %vm427_vm4, %v426_v0, %v424_v44  ;;  %v3164_v41 = vmov %v3163_v6 }
  0xe4   :  { %v2267_v7 = vmul.f32 %v3164_v41, %v2158_v3  ;;  %v2270_v63 = vmul.f32 %v1730_v53, %v429_v35  ;;  %v2273_v39 = vmul.f32 %v1733_v54, %v428_v8  ;;  %v3167_v44 = vstv %s3152_s14  ;;  %s3204_s14 = sld [smem:[#allocation41_spill]] }
  0xe5   :  { %v2279_v0 = vmul.f32 %v3167_v44, %v2161_v33  ;;  %v3169_v6 = vmov %v3167_v44  ;;  %v3171_v41 = vstv %s3156_s28  ;;  %v3176_v8 = vstv %s1870_s12  ;;  %s3188_s12 = sld [smem:[#allocation34_spill]]  ;;  %s3205_s28 = sld [smem:[#allocation40_spill]] }
  0xe6   :  { %3165 = vst [vmem:[#allocation104_spill] sm:$0xff] %v2270_v63  ;;  %v2284_v42 = vmul.f32 %v3169_v6, %v2158_v3  ;;  %v2289_v37 = vmul.f32 %v3171_v41, %v2161_v33  ;;  %v3173_v53 = vmov %v3171_v41  ;;  %v2299_v35 = vmul.f32 %v3176_v8, %v2161_v33  ;;  %v526_v6 = vpop.permute.xlu1 %525 }
  0xe7   :  { %3168 = vst [vmem:[#allocation105_spill] sm:$0xff] %v2279_v0  ;;  %v2294_v54 = vmul.f32 %v3173_v53, %v2158_v3  ;;  %v3178_v44 = vmov %v3176_v8  ;;  %v3182_v0 = vstv %s3162_s15  ;;  %v872_v8 = vpop.permute.xlu0 %871  ;;  %s3209_s15 = sld [smem:[#allocation39_spill]] }
  0xe8   :  { %3170 = vst [vmem:[#allocation106_spill] sm:$0xff] %v2284_v42  ;;  %3172 = vst [vmem:[#allocation107_spill] sm:$0xff] %v2289_v37  ;;  %v2304_v4 = vmul.f32 %v3178_v44, %v2158_v3  ;;  %v3180_v42 = vstv %s3161_s30  ;;  %v465_v53 = vmul.f32 %v3182_v0, %v2273_v39  ;;  %v528_v44 = vsel %vm527_vm5, %v524_v10, %v526_v6  ;;  %s3208_s30 = sld [smem:[#allocation42_spill]] }
  0xe9   :  { %3175 = vst [vmem:[#allocation108_spill] sm:$0xff] %v2294_v54  ;;  %3177 = vst [vmem:[#allocation109_spill] sm:$0xff] %v2299_v35  ;;  %v455_v19 = vmul.f32 %v3180_v42, %v2273_v39  ;;  %v3181_v41 = vmov %v3180_v42  ;;  %v3183_v54 = vmov %v3182_v0  ;;  %v3185_v42 = vstv %s3166_s2  ;;  %s3216_s2 = sld [smem:[#allocation47_spill]] }
  0xea   :  { %3179 = vst [vmem:[#allocation110_spill] sm:$0xff] %v2304_v4  ;;  %v454_v37 = vmul.f32 %v3181_v41, %v2270_v63  ;;  %v464_v9 = vmul.f32 %v3183_v54, %v2270_v63  ;;  %v529_v4 = vsel %vm527_vm5, %v526_v6, %v524_v10  ;;  %v475_v33 = vmul.f32 %v3185_v42, %v2273_v39 }
  0xeb   :  { %v3186_v41 = vmov %v3185_v42  ;;  %v2329_v0 = vmul.f32 %v1736_v55, %v529_v4  ;;  %v2332_v54 = vmul.f32 %v1744_v57, %v528_v44  ;;  %v3187_v35 = vstv %s3174_s0  ;;  %v774_v44 = vpop.permute.xlu1 %773  ;;  %s3217_s0 = sld [smem:[#allocation43_spill]] }
  0xec   :  { %v474_v3 = vmul.f32 %v3186_v41, %v2270_v63  ;;  %v2337_v59 = vmul.f32 %v3187_v35, %v2006_v40  ;;  %v3190_v61 = vmov %v3187_v35  ;;  %v460_v6 = vadd.f32 %v2092_v29, %v455_v19  ;;  %v328_v29 = vpop.permute.xlu0 %327 }
  0xed   :  { %v2342_v10 = vmul.f32 %v3190_v61, %v2009_v43  ;;  %v459_v42 = vadd.f32 %v2097_v20, %v454_v37  ;;  %v2347_v55 = vadd.f32 %v468_v46, %v465_v53  ;;  %v3192_v57 = vstv %s1880_s17 }
  0xee   :  { %3189 = vst [vmem:[#allocation111_spill] sm:$0xff] %v2337_v59  ;;  %v2352_v4 = vmul.f32 %v3192_v57, %v2025_v14  ;;  %v3194_v40 = vstv %s3184_s20  ;;  %v2361_v41 = vadd.f32 %v2125_v21, %v464_v9  ;;  %v2364_v37 = vadd.f32 %v2130_v27, %v475_v33  ;;  %s3219_s20 = sld [smem:[#allocation44_spill]] }
  0xef   :  { %3191 = vst [vmem:[#allocation112_spill] sm:$0xff] %v2342_v10  ;;  %v555_v35 = vmul.f32 %v3194_v40, %v2332_v54  ;;  %v3195_v43 = vmov %v3194_v40  ;;  %v776_v14 = vsel %vm775_vm6, %v772_v25, %v774_v44  ;;  %v777_v19 = vsel %vm775_vm6, %v774_v44, %v772_v25  ;;  %v874_v44 = vpop.permute.xlu1 %873 }
  0xf0   :  { %3193 = vst [vmem:[#allocation113_spill] sm:$0xff] %v2352_v4  ;;  %v554_v61 = vmul.f32 %v3195_v43, %v2329_v0  ;;  %v3198_v20 = vstv %s3188_s12  ;;  %v2374_v53 = vadd.f32 %v2135_v13, %v474_v3  ;;  %v2377_v21 = vmul.f32 %v1747_v58, %v776_v14  ;;  %s3221_s12 = sld [smem:[#allocation51_spill]] }
  0xf1   :  { %v565_v46 = vmul.f32 %v3198_v20, %v2332_v54  ;;  %v2380_v33 = vmul.f32 %v1756_v62, %v777_v19  ;;  %v332_v25 = vsel %vm331_vm3, %v2033_v11, %v328_v29  ;;  %v333_v27 = vsel %vm331_vm3, %v328_v29, %v2033_v11 }
  0xf2   :  { %v2389_v9 = vmul.f32 %v1712_v48, %v333_v27  ;;  %v2392_v3 = vmul.f32 %v1715_v49, %v332_v25  ;;  %v3200_v58 = vmov %v3198_v20  ;;  %v3201_v62 = vstv %s3196_s6  ;;  %v879_v20 = vpop.permute.xlu0 %878 }
  0xf3   :  { %v2397_v13 = vmul.f32 %v3200_v58, %v2329_v0  ;;  %v2402_v57 = vmul.f32 %v3201_v62, %v2332_v54  ;;  %v560_v40 = vadd.f32 %v2178_v60, %v555_v35  ;;  %v3202_v43 = vstv %s3197_s3  ;;  %s3223_s3 = sld [smem:[#allocation49_spill]] }
  0xf4   :  { %v803_v11 = vmul.f32 %v3202_v43, %v2380_v33  ;;  %v559_v48 = vadd.f32 %v2183_v2, %v554_v61  ;;  %v3203_v14 = vmov %v3202_v43  ;;  %v876_v19 = vsel %vm875_vm7, %v872_v8, %v874_v44 }
  0xf5   :  { %v802_v49 = vmul.f32 %v3203_v14, %v2377_v21  ;;  %v877_v29 = vsel %vm875_vm7, %v874_v44, %v872_v8  ;;  %v3206_v60 = vstv %s3199_s19  ;;  %v2423_v2 = vmul.f32 %v1789_v16, %v876_v19  ;;  %v974_v19 = vpop.permute.xlu1 %973  ;;  %s3224_s19 = sld [smem:[#allocation53_spill]] }
  0xf6   :  { %v369_v35 = vmul.f32 %v3206_v60, %v2392_v3  ;;  %v3207_v25 = vmov %v3206_v60  ;;  %v2426_v61 = vmul.f32 %v1798_v22, %v877_v29  ;;  %v882_v8 = vsel %vm875_vm7, %v879_v20, %v2163_v51 }
  0xf7   :  { %v368_v27 = vmul.f32 %v3207_v25, %v2389_v9  ;;  %v883_v58 = vsel %vm875_vm7, %v2163_v51, %v879_v20  ;;  %v2435_v62 = vmul.f32 %v1789_v16, %v882_v8  ;;  %v570_v14 = vadd.f32 %v2188_v18, %v565_v46  ;;  %v972_v20 = vpop.permute.xlu0 %971 }
  0xf8   :  { %v2438_v44 = vmul.f32 %v1798_v22, %v883_v58  ;;  %v374_v43 = vadd.f32 %v2038_v1, %v369_v35  ;;  %v3210_v29 = vstv %s3204_s14  ;;  %v3212_v51 = vstv %s3205_s28  ;;  %s2499_s14 = sld [smem:[#allocation11 + $0x4c]] }
  0xf9   :  { %v903_v60 = vmul.f32 %v3210_v29, %v2426_v61  ;;  %v373_v25 = vadd.f32 %v2043_v32, %v368_v27  ;;  %v3211_v4 = vmov %v3210_v29  ;;  %v813_v16 = vmul.f32 %v3212_v51, %v2380_v33 }
  0xfa   :  { %v902_v10 = vmul.f32 %v3211_v4, %v2423_v2  ;;  %v462_v8 = vadd.f32 %v460_v6, %v374_v43  ;;  %v3213_v22 = vstv %s3208_s30  ;;  %v3215_v46 = vstv %s3209_s15  ;;  %s3234_s30 = sld [smem:[#allocation54_spill]] }
  0xfb   :  { %v906_v58 = vmul.f32 %v3213_v22, %v2438_v44  ;;  %v3214_v1 = vmov %v3213_v22  ;;  %v377_v35 = vmul.f32 %v3215_v46, %v2392_v3  ;;  %v976_v32 = vsel %vm975_vm8, %v972_v20, %v974_v19 }
  0xfc   :  { %v905_v18 = vmul.f32 %v3214_v1, %v2435_v62  ;;  %v977_v4 = vsel %vm975_vm8, %v974_v19, %v972_v20  ;;  %v808_v27 = vadd.f32 %v2238_v5, %v803_v11  ;;  %v461_v6 = vadd.f32 %v459_v42, %v373_v25  ;;  %v981_v1 = vpop.permute.xlu1 %980  ;;  %v979_v20 = vpop.permute.xlu0 %978 }
  0xfd   :  { %v2467_v43 = vmul.f32 %v1818_v30, %v976_v32  ;;  %v2470_v29 = vmul.f32 %v1821_v31, %v977_v4  ;;  %v562_v51 = vadd.f32 %v560_v40, %v462_v8  ;;  %v807_v22 = vadd.f32 %v2243_v12, %v802_v49 }
  0xfe   :  { %v908_v46 = vadd.f32 %v906_v58, %v903_v60  ;;  %v561_v59 = vadd.f32 %v559_v48, %v461_v6  ;;  %v382_v63 = vadd.f32 %v2048_v52, %v377_v35  ;;  %v818_v19 = vadd.f32 %v2248_v24, %v813_v16 }
  0xff   :  { %v3218_v5 = vcombine.high %v1801_v23, %v1801_v23  ;;  %v3220_v11 = vstv %s3216_s2  ;;  %v907_v12 = vadd.f32 %v905_v18, %v902_v10  ;;  %v3222_v49 = vstv %s3217_s0  ;;  %s3238_s2 = sld [smem:[#allocation57_spill]] }
 0x100   :  { %v1003_v40 = vmul.f32 %v3220_v11, %v2470_v29  ;;  %v913_v48 = vmul.f32 %v3222_v49, %v2426_v61  ;;  %v982_v24 = vsel %vm975_vm8, %v979_v20, %v981_v1  ;;  %v983_v52 = vsel %vm975_vm8, %v981_v1, %v979_v20 }
 0x101   :  { %v662_v42 = vadd.f32 %v3218_v5, %v562_v51  ;;  %v661_v60 = vadd.f32 %v1801_v23, %v561_v59  ;;  %v472_v25 = vadd.f32 %v2347_v55, %v382_v63  ;;  %v2491_v16 = vmul.f32 %v1818_v30, %v982_v24 }
 0x102   :  { %v2494_v10 = vmul.f32 %v1821_v31, %v983_v52  ;;  %v3225_v58 = vmov %v3220_v11  ;;  %v3226_v4 = vstv %s3219_s20  ;;  %v3227_v59 = vstv %s3209_s15  ;;  %s3236_s15 = sld [smem:[#allocation55_spill]]  ;;  %s3242_s20 = sld [smem:[#allocation66_spill]] }
 0x103   :  { %v810_v8 = vadd.f32 %v808_v27, %v662_v42  ;;  %v1002_v18 = vmul.f32 %v3225_v58, %v2467_v43  ;;  %v809_v35 = vadd.f32 %v807_v22, %v661_v60  ;;  %v572_v32 = vadd.f32 %v570_v14, %v472_v25 }
 0x104   :  { %v916_v23 = vmul.f32 %v3226_v4, %v2438_v44  ;;  %v376_v30 = vmul.f32 %v3227_v59, %v2389_v9  ;;  %v3228_v63 = vstv %s3221_s12  ;;  %v3230_v6 = vstv %s3223_s3  ;;  %s3245_s12 = sld [smem:[#allocation62_spill]] }
 0x105   :  { %v1006_v31 = vmul.f32 %v3228_v63, %v2494_v10  ;;  %v3229_v55 = vmov %v3228_v63  ;;  %v1013_v51 = vmul.f32 %v3230_v6, %v2470_v29  ;;  %v3231_v22 = vstv %s3224_s19  ;;  %s3253_s19 = sld [smem:[#allocation56_spill]] }
 0x106   :  { %v1005_v27 = vmul.f32 %v3229_v55, %v2491_v16  ;;  %v1016_v14 = vmul.f32 %v3231_v22, %v2494_v10  ;;  %v910_v1 = vadd.f32 %v908_v46, %v810_v8  ;;  %v909_v20 = vadd.f32 %v907_v12, %v809_v35 }
 0x107   :  { %v3232_v5 = vcombine.high %v1830_v36, %v1830_v36  ;;  %v381_v11 = vadd.f32 %v2053_v28, %v376_v30  ;;  %v1008_v49 = vadd.f32 %v1006_v31, %v1003_v40  ;;  %v569_v52 = vadd.f32 %v2193_v45, %v2397_v13 }
 0x108   :  { %v1007_v24 = vadd.f32 %v1005_v27, %v1002_v18  ;;  %v3233_v60 = vstv %s3205_s28  ;;  %v3235_v12 = vstv %s3217_s0  ;;  %v3237_v35 = vmov %v3226_v4  ;;  %s3241_s28 = sld [smem:[#allocation59_spill]]  ;;  %s1515_s0 = smov 48  }
 0x109   :  { %v680_v42 = vadd.f32 %v3232_v5, %v572_v32  ;;  %v812_v25 = vmul.f32 %v3233_v60, %v2377_v21  ;;  %v471_v46 = vadd.f32 %v2361_v41, %v381_v11  ;;  %v912_v8 = vmul.f32 %v3235_v12, %v2423_v2 }
 0x10a   :  { %v915_v28 = vmul.f32 %v3237_v35, %v2435_v62  ;;  %v1010_v40 = vadd.f32 %v1008_v49, %v910_v1  ;;  %v1009_v18 = vadd.f32 %v1007_v24, %v909_v20  ;;  %v918_v32 = vadd.f32 %v916_v23, %v913_v48 }
 0x10b   :  { %v820_v58 = vadd.f32 %v818_v19, %v680_v42  ;;  %v1018_v45 = vadd.f32 %v1016_v14, %v1013_v51  ;;  %v571_v13 = vadd.f32 %v569_v52, %v471_v46  ;;  %v817_v19 = vadd.f32 %v2253_v15, %v812_v25 }
 0x10c   :  { %v3239_v4 = vmov %v3231_v22  ;;  %v3240_v59 = vstv %s3196_s6  ;;  %1073 = vrot.lane.b32.xlu1 %v1010_v40, %s1515_s0  ;;  %1071 = vrot.lane.b32.xlu0 %v1009_v18, %s1515_s0  ;;  %v3243_v48 = vstv %s3234_s30  ;;  %v917_v6 = vadd.f32 %v915_v28, %v912_v8  ;;  %s1516_s6 = smov 32   ;;  %s3254_s0 = sld [smem:[#allocation60_spill]] }
 0x10d   :  { %v1015_v41 = vmul.f32 %v3239_v4, %v2491_v16  ;;  %v574_v30 = vmul.f32 %v3240_v59, %v2329_v0  ;;  %v920_v63 = vadd.f32 %v918_v32, %v820_v58  ;;  %v385_v23 = vmul.f32 %v3243_v48, %v2392_v3  ;;  %s3257_s30 = sld [smem:[#allocation64_spill]] }
 0x10e   :  { %v3244_v31 = vstv %s3236_s15  ;;  %v1034_v15 = vstv %s2499_s14  ;;  %v679_v27 = vadd.f32 %v1830_v36, %v571_v13  ;;  %v3246_v51 = vstv %s3223_s3  ;;  %s3251_s3 = sld [smem:[#allocation63_spill]]  ;;  %s3266_s15 = sld [smem:[#allocation69_spill]] }
 0x10f   :  { %v823_v55 = vmul.f32 %v3244_v31, %v2380_v33  ;;  %v1012_v22 = vmul.f32 %v3246_v51, %v2467_v43  ;;  %v3247_v14 = vstv %s3238_s2  ;;  %v1020_v20 = vadd.f32 %v1018_v45, %v920_v63  ;;  %s3269_s2 = sld [smem:[#allocation72_spill]] }
 0x110   :  { %v923_v1 = vmul.f32 %v3247_v14, %v2426_v61  ;;  %v390_v5 = vadd.f32 %v2062_v38, %v385_v23  ;;  %v580_v42 = vadd.f32 %v2198_v34, %v2402_v57  ;;  %v3248_v11 = vstv %s3241_s28  ;;  %s3279_s28 = sld [smem:[#allocation58_spill]] }
 0x111   :  { %v926_v49 = vmul.f32 %v3248_v11, %v2438_v44  ;;  %v819_v36 = vadd.f32 %v817_v19, %v679_v27  ;;  %v1017_v24 = vadd.f32 %v1015_v41, %v1012_v22  ;;  %v3249_v52 = vstv %s3242_s20  ;;  %1095 = vrot.lane.b32.xlu1 %v1020_v20, %s1516_s6  ;;  %s3282_s20 = sld [smem:[#allocation70_spill]] }
 0x112   :  { %v1026_v60 = vmul.f32 %v3249_v52, %v2494_v10  ;;  %v3250_v25 = vmov %v3243_v48  ;;  %v482_v38 = vadd.f32 %v2364_v37, %v390_v5  ;;  %v828_v34 = vadd.f32 %v2262_v26, %v823_v55 }
 0x113   :  { %v384_v58 = vmul.f32 %v3250_v25, %v2389_v9  ;;  %v3252_v57 = vstv %s3245_s12  ;;  %v579_v12 = vadd.f32 %v2203_v50, %v574_v30  ;;  %v919_v8 = vadd.f32 %v917_v6, %v819_v36  ;;  %v3268_v36 = vld [vmem:[#allocation90_spill] sm:$0xff]  ;;  %s3285_s12 = smov 16  }
 0x114   :  { %v1023_v46 = vmul.f32 %v3252_v57, %v2470_v29  ;;  %v928_v35 = vadd.f32 %v926_v49, %v923_v1  ;;  %v3255_v40 = vmov %v3244_v31  ;;  %v582_v32 = vadd.f32 %v580_v42, %v482_v38 }
 0x115   :  { %v389_v28 = vadd.f32 %v2067_v56, %v384_v58  ;;  %v822_v18 = vmul.f32 %v3255_v40, %v2377_v21  ;;  %v3256_v37 = vmov %v3247_v14  ;;  %v3258_v45 = vmov %v3248_v11  ;;  %v3265_v14 = vld [vmem:[#allocation82_spill] sm:$0xff] }
 0x116   :  { %v922_v26 = vmul.f32 %v3256_v37, %v2423_v2  ;;  %v925_v13 = vmul.f32 %v3258_v45, %v2435_v62  ;;  %v3259_v19 = vmov %v3249_v52  ;;  %v1019_v50 = vadd.f32 %v1017_v24, %v919_v8  ;;  %v3273_v8 = vld [vmem:[#allocation105_spill] sm:$0xff]  ;;  %v3276_v37 = vld [vmem:[#allocation104_spill] sm:$0xff] }
 0x117   :  { %v1025_v4 = vmul.f32 %v3259_v19, %v2491_v16  ;;  %v1028_v41 = vadd.f32 %v1026_v60, %v1023_v46  ;;  %v481_v59 = vadd.f32 %v2374_v53, %v389_v28  ;;  %v3260_v56 = vstv %s3251_s3  ;;  %v3270_v60 = vld [vmem:[#allocation98_spill] sm:$0xff] }
 0x118   :  { %v401_v30 = vmul.f32 %v3260_v56, %v2392_v3  ;;  %v3261_v63 = vcombine.high %v1874_v17, %v1874_v17  ;;  %v3262_v23 = vmov %v3252_v57  ;;  %v3263_v55 = vstv %s3253_s19  ;;  %1093 = vrot.lane.b32.xlu0 %v1019_v50, %s1516_s6 }
 0x119   :  { %v1022_v31 = vmul.f32 %v3262_v23, %v2467_v43  ;;  %v495_v27 = vmul.f32 %v3263_v55, %v2273_v39  ;;  %v3264_v6 = vstv %s3254_s0  ;;  %v581_v53 = vadd.f32 %v579_v12, %v481_v59  ;;  %v3283_v23 = vld [vmem:[#allocation91_spill] sm:$0xff] }
 0x11a   :  { %v698_v48 = vadd.f32 %v3261_v63, %v582_v32  ;;  %v595_v51 = vmul.f32 %v3264_v6, %v2332_v54  ;;  %v827_v22 = vadd.f32 %v2267_v7, %v822_v18  ;;  %v406_v1 = vadd.f32 %v3265_v14, %v401_v30 }
 0x11b   :  { %v3267_v20 = vstv %s3257_s30  ;;  %v927_v11 = vadd.f32 %v925_v13, %v922_v26  ;;  %v1027_v49 = vadd.f32 %v1025_v4, %v1022_v31  ;;  %v500_v24 = vadd.f32 %v3268_v36, %v495_v27 }
 0x11c   :  { %v843_v5 = vmul.f32 %v3267_v20, %v2380_v33  ;;  %v830_v42 = vadd.f32 %v828_v34, %v698_v48  ;;  %v697_v52 = vadd.f32 %v1874_v17, %v581_v53  ;;  %v600_v25 = vadd.f32 %v3270_v60, %v595_v51  ;;  %v3288_v53 = vld [vmem:[#allocation99_spill] sm:$0xff] }
 0x11d   :  { %v3271_v7 = vstv %s3096_s29  ;;  %v3272_v38 = vstv %s3097_s24  ;;  %v502_v12 = vadd.f32 %v500_v24, %v406_v1  ;;  %v3274_v28 = vmov %v3260_v56  ;;  %v3281_v56 = vld [vmem:[#allocation83_spill] sm:$0xff]  ;;  %s1517_s24 = smov 112   ;;  %s3331_s29 = sld [smem:[#allocation76_spill]] }
 0x11e   :  { %v943_v58 = vmul.f32 %v3271_v7, %v2426_v61  ;;  %v946_v57 = vmul.f32 %v3272_v38, %v2438_v44  ;;  %v930_v46 = vadd.f32 %v928_v35, %v830_v42  ;;  %v848_v34 = vadd.f32 %v3273_v8, %v843_v5 }
 0x11f   :  { %v400_v40 = vmul.f32 %v3274_v28, %v2389_v9  ;;  %v829_v18 = vadd.f32 %v827_v22, %v697_v52  ;;  %v3275_v17 = vstv %s3266_s15  ;;  %v3277_v26 = vmov %v3263_v55  ;;  %v3296_v28 = vld [vmem:[#allocation84_spill] sm:$0xff] }
 0x120   :  { %v1043_v32 = vmul.f32 %v3275_v17, %v2470_v29  ;;  %v494_v45 = vmul.f32 %v3277_v26, %v3276_v37  ;;  %v3278_v13 = vmov %v3264_v6  ;;  %v1030_v35 = vadd.f32 %v1028_v41, %v930_v46  ;;  %v3286_v41 = vld [vmem:[#allocation75_spill] sm:$0xff] }
 0x121   :  { %v594_v19 = vmul.f32 %v3278_v13, %v2329_v0  ;;  %v602_v4 = vadd.f32 %v600_v25, %v502_v12  ;;  %v3280_v50 = vstv %s3269_s2  ;;  %v405_v30 = vadd.f32 %v3281_v56, %v400_v40  ;;  %v3299_v13 = vld [vmem:[#allocation92_spill] sm:$0xff] }
 0x122   :  { %v1046_v59 = vmul.f32 %v3280_v50, %v2494_v10  ;;  %v929_v63 = vadd.f32 %v927_v11, %v829_v18  ;;  %v948_v48 = vadd.f32 %v946_v57, %v943_v58  ;;  %v499_v31 = vadd.f32 %v3283_v23, %v494_v45  ;;  %1119 = vrot.lane.b32.xlu1 %v1030_v35, %s3285_s12 }
 0x123   :  { %v3284_v55 = vmov %v3267_v20  ;;  %v3287_v6 = vcombine.high %v3286_v41, %v3286_v41  ;;  %v599_v22 = vadd.f32 %v3288_v53, %v594_v19  ;;  %v3289_v14 = vmov %v3271_v7 }
 0x124   :  { %v842_v27 = vmul.f32 %v3284_v55, %v2377_v21  ;;  %v942_v1 = vmul.f32 %v3289_v14, %v2423_v2  ;;  %v3290_v20 = vmov %v3272_v38  ;;  %v1029_v42 = vadd.f32 %v1027_v49, %v929_v63 }
 0x125   :  { %v734_v51 = vadd.f32 %v3287_v6, %v602_v4  ;;  %v945_v5 = vmul.f32 %v3290_v20, %v2435_v62  ;;  %v501_v11 = vadd.f32 %v499_v31, %v405_v30  ;;  %v3291_v36 = vmov %v3280_v50  ;;  %v3302_v31 = vld [vmem:[#allocation100_spill] sm:$0xff] }
 0x126   :  { %v1045_v24 = vmul.f32 %v3291_v36, %v2491_v16  ;;  %v3292_v52 = vstv %s3279_s28  ;;  %v1048_v7 = vadd.f32 %v1046_v59, %v1043_v32  ;;  %v3293_v58 = vstv %s3282_s20  ;;  %1117 = vrot.lane.b32.xlu0 %v1029_v42, %s3285_s12  ;;  %v3298_v32 = vld [vmem:[#allocation106_spill] sm:$0xff] }
 0x127   :  { %v409_v60 = vmul.f32 %v3292_v52, %v2392_v3  ;;  %v850_v25 = vadd.f32 %v848_v34, %v734_v51  ;;  %v505_v38 = vmul.f32 %v3293_v58, %v2273_v39  ;;  %v3294_v57 = vstv %s1876_s22  ;;  %v3304_v51 = vld [vmem:[#allocation107_spill] sm:$0xff]  ;;  %s3354_s22 = sld [smem:[#allocation77_spill]] }
 0x128   :  { %v605_v46 = vmul.f32 %v3294_v57, %v2332_v54  ;;  %v601_v49 = vadd.f32 %v599_v22, %v501_v11  ;;  %v3295_v12 = vmov %v3275_v17  ;;  %v3297_v18 = vstv %s1888_s11  ;;  %s3319_s11 = sld [smem:[#allocation74_spill]] }
 0x129   :  { %v1042_v8 = vmul.f32 %v3295_v12, %v2467_v43  ;;  %v414_v40 = vadd.f32 %v3296_v28, %v409_v60  ;;  %v853_v34 = vmul.f32 %v3297_v18, %v2380_v33  ;;  %v950_v17 = vadd.f32 %v948_v48, %v850_v25 }
 0x12a   :  { %v847_v26 = vadd.f32 %v3298_v32, %v842_v27  ;;  %v947_v45 = vadd.f32 %v945_v5, %v942_v1  ;;  %v510_v19 = vadd.f32 %v3299_v13, %v505_v38  ;;  %v733_v35 = vadd.f32 %v3286_v41, %v601_v49 }
 0x12b   :  { %v1047_v4 = vadd.f32 %v1045_v24, %v1042_v8  ;;  %v3300_v50 = vstv %s1898_s16  ;;  %v3301_v56 = vstv %s1900_s4  ;;  %v1050_v63 = vadd.f32 %v1048_v7, %v950_v17  ;;  %v3309_v24 = vld [vmem:[#allocation85_spill] sm:$0xff]  ;;  %s3324_s4 = sld [smem:[#allocation67_spill]] }
 0x12c   :  { %v953_v59 = vmul.f32 %v3300_v50, %v2426_v61  ;;  %v956_v30 = vmul.f32 %v3301_v56, %v2438_v44  ;;  %v512_v23 = vadd.f32 %v510_v19, %v414_v40  ;;  %v610_v48 = vadd.f32 %v3302_v31, %v605_v46  ;;  %v3310_v7 = vld [vmem:[#allocation93_spill] sm:$0xff]  ;;  %v3312_v46 = vld [vmem:[#allocation78_spill] sm:$0xff] }
 0x12d   :  { %v3303_v55 = vmov %v3292_v52  ;;  %v849_v6 = vadd.f32 %v847_v26, %v733_v35  ;;  %v858_v41 = vadd.f32 %v3304_v51, %v853_v34  ;;  %v3305_v53 = vmov %v3293_v58  ;;  %1160 = vrot.lane.b32.xlu1 %v1050_v63, %s1517_s24  ;;  %v3314_v8 = vld [vmem:[#allocation101_spill] sm:$0xff] }
 0x12e   :  { %v408_v27 = vmul.f32 %v3303_v55, %v2389_v9  ;;  %v504_v22 = vmul.f32 %v3305_v53, %v3276_v37  ;;  %v3306_v14 = vmov %v3294_v57  ;;  %v612_v20 = vadd.f32 %v610_v48, %v512_v23  ;;  %v3323_v55 = vld [vmem:[#allocation86_spill] sm:$0xff] }
 0x12f   :  { %v604_v1 = vmul.f32 %v3306_v14, %v2329_v0  ;;  %v3307_v5 = vstv %s1916_s26  ;;  %v3308_v11 = vstv %s1925_s9  ;;  %v949_v60 = vadd.f32 %v947_v45, %v849_v6  ;;  %v3325_v6 = vld [vmem:[#allocation81_spill] sm:$0xff]  ;;  %s1518_s26 = smov 96  }
 0x130   :  { %v1053_v42 = vmul.f32 %v3307_v5, %v2470_v29  ;;  %v1056_v36 = vmul.f32 %v3308_v11, %v2494_v10  ;;  %v413_v52 = vadd.f32 %v3309_v24, %v408_v27  ;;  %v958_v25 = vadd.f32 %v956_v30, %v953_v59 }
 0x131   :  { %v509_v58 = vadd.f32 %v3310_v7, %v504_v22  ;;  %v3311_v38 = vmov %v3297_v18  ;;  %v3313_v49 = vcombine.high %v3312_v46, %v3312_v46  ;;  %v609_v28 = vadd.f32 %v3314_v8, %v604_v1  ;;  %v3327_v22 = vld [vmem:[#allocation108_spill] sm:$0xff] }
 0x132   :  { %v852_v57 = vmul.f32 %v3311_v38, %v2377_v21  ;;  %v3315_v40 = vmov %v3300_v50  ;;  %v3316_v34 = vmov %v3301_v56  ;;  %v1049_v32 = vadd.f32 %v1047_v4, %v949_v60  ;;  %v3328_v1 = vld [vmem:[#allocation96_spill] sm:$0xff] }
 0x133   :  { %v752_v12 = vadd.f32 %v3313_v49, %v612_v20  ;;  %v952_v18 = vmul.f32 %v3315_v40, %v2423_v2  ;;  %v955_v17 = vmul.f32 %v3316_v34, %v2435_v62  ;;  %v511_v26 = vadd.f32 %v509_v58, %v413_v52 }
 0x134   :  { %v3317_v45 = vmov %v3308_v11  ;;  %v3318_v19 = vstv %s1919_s23  ;;  %v1058_v59 = vadd.f32 %v1056_v36, %v1053_v42  ;;  %v3320_v56 = vstv %s1892_s8  ;;  %1158 = vrot.lane.b32.xlu0 %v1049_v32, %s1517_s24 }
 0x135   :  { %v1055_v13 = vmul.f32 %v3317_v45, %v2491_v16  ;;  %v417_v35 = vmul.f32 %v3318_v19, %v2392_v3  ;;  %v860_v50 = vadd.f32 %v858_v41, %v752_v12  ;;  %v515_v30 = vmul.f32 %v3320_v56, %v2273_v39 }
 0x136   :  { %v3321_v63 = vstv %s1911_s18  ;;  %v611_v4 = vadd.f32 %v609_v28, %v511_v26  ;;  %v3322_v31 = vmov %v3307_v5  ;;  %v3326_v51 = vstv %s1880_s17  ;;  %v3329_v5 = vld [vmem:[#allocation88_spill] sm:$0xff]  ;;  %s3346_s17 = sld [smem:[#allocation73_spill]]  ;;  %s3352_s18 = sld [smem:[#allocation68_spill]] }
 0x137   :  { %v615_v23 = vmul.f32 %v3321_v63, %v2332_v54  ;;  %v1052_v48 = vmul.f32 %v3322_v31, %v2467_v43  ;;  %v422_v27 = vadd.f32 %v3323_v55, %v417_v35  ;;  %v488_v41 = vmul.f32 %v3326_v51, %v3325_v6  ;;  %v3340_v35 = vld [vmem:[#allocation87_spill] sm:$0xff] }
 0x138   :  { %v960_v53 = vadd.f32 %v958_v25, %v860_v50  ;;  %v857_v14 = vadd.f32 %v3327_v22, %v852_v57  ;;  %v520_v20 = vadd.f32 %v3328_v1, %v515_v30  ;;  %v3330_v42 = vstv %s1895_s7  ;;  %v3333_v25 = vld [vmem:[#allocation102_spill] sm:$0xff] }
 0x139   :  { %v587_v11 = vmul.f32 %v3330_v42, %v3329_v5  ;;  %v751_v36 = vadd.f32 %v3312_v46, %v611_v4  ;;  %v957_v24 = vadd.f32 %v955_v17, %v952_v18  ;;  %v1057_v52 = vadd.f32 %v1055_v13, %v1052_v48  ;;  %v3343_v4 = vld [vmem:[#allocation97_spill] sm:$0xff]  ;;  %v3344_v48 = vld [vmem:[#allocation79_spill] sm:$0xff] }
 0x13a   :  { %v3332_v60 = vstv %s3319_s11  ;;  %v1060_v58 = vadd.f32 %v1058_v59, %v960_v53  ;;  %v522_v38 = vadd.f32 %v520_v20, %v422_v27  ;;  %v620_v49 = vadd.f32 %v3333_v25, %v615_v23  ;;  %v3350_v42 = vld [vmem:[#allocation103_spill] sm:$0xff] }
 0x13b   :  { %v863_v7 = vmul.f32 %v3332_v60, %v2380_v33  ;;  %v3334_v57 = vmov %v3318_v19  ;;  %v859_v8 = vadd.f32 %v857_v14, %v751_v36  ;;  %v3335_v28 = vstv %s3324_s4 }
 0x13c   :  { %v416_v12 = vmul.f32 %v3334_v57, %v2389_v9  ;;  %v963_v46 = vmul.f32 %v3335_v28, %v2426_v61  ;;  %v3336_v40 = vmov %v3320_v56  ;;  %v3337_v34 = vmov %v3321_v63  ;;  %1184 = vrot.lane.b32.xlu1 %v1060_v58, %s1518_s26  ;;  %v3341_v56 = vld [vmem:[#allocation109_spill] sm:$0xff] }
 0x13d   :  { %v514_v18 = vmul.f32 %v3336_v40, %v3276_v37  ;;  %v614_v17 = vmul.f32 %v3337_v34, %v2329_v0  ;;  %v622_v32 = vadd.f32 %v620_v49, %v522_v38  ;;  %v3338_v26 = vstv %s3331_s29  ;;  %v3355_v57 = vld [vmem:[#allocation89_spill] sm:$0xff]  ;;  %v3359_v34 = vld [vmem:[#allocation95_spill] sm:$0xff] }
 0x13e   :  { %v966_v45 = vmul.f32 %v3338_v26, %v2438_v44  ;;  %v3339_v13 = vstv %s1960_s5  ;;  %v421_v50 = vadd.f32 %v3340_v35, %v416_v12  ;;  %v959_v59 = vadd.f32 %v957_v24, %v859_v8 }
 0x13f   :  { %v1066_v19 = vmul.f32 %v3339_v13, %v2494_v10  ;;  %v868_v30 = vadd.f32 %v3341_v56, %v863_v7  ;;  %v3342_v63 = vstv %s1951_s13  ;;  %v519_v31 = vadd.f32 %v3343_v4, %v514_v18 }
 0x140   :  { %v1063_v23 = vmul.f32 %v3342_v63, %v2470_v29  ;;  %v3345_v55 = vcombine.high %v3344_v48, %v3344_v48  ;;  %v3347_v6 = vmov %v3332_v60  ;;  %v3348_v53 = vmov %v3335_v28  ;;  %v3357_v28 = vld [vmem:[#allocation94_spill] sm:$0xff] }
 0x141   :  { %v862_v51 = vmul.f32 %v3347_v6, %v2377_v21  ;;  %v962_v22 = vmul.f32 %v3348_v53, %v2423_v2  ;;  %v3349_v14 = vmov %v3338_v26  ;;  %v1059_v20 = vadd.f32 %v1057_v52, %v959_v59  ;;  %v3368_v53 = vld [vmem:[#allocation111_spill] sm:$0xff] }
 0x142   :  { %v770_v27 = vadd.f32 %v3345_v55, %v622_v32  ;;  %v965_v1 = vmul.f32 %v3349_v14, %v2435_v62  ;;  %v521_v5 = vadd.f32 %v519_v31, %v421_v50  ;;  %v619_v36 = vadd.f32 %v3350_v42, %v614_v17 }
 0x143   :  { %v3351_v24 = vmov %v3339_v13  ;;  %v968_v58 = vadd.f32 %v966_v45, %v963_v46  ;;  %v1068_v38 = vadd.f32 %v1066_v19, %v1063_v23  ;;  %v3353_v25 = vmov %v3342_v63  ;;  %1182 = vrot.lane.b32.xlu0 %v1059_v20, %s1518_s26  ;;  %v3361_v46 = vld [vmem:[#allocation110_spill] sm:$0xff] }
 0x144   :  { %v1065_v60 = vmul.f32 %v3351_v24, %v2491_v16  ;;  %v870_v7 = vadd.f32 %v868_v30, %v770_v27  ;;  %v1062_v49 = vmul.f32 %v3353_v25, %v2467_v43  ;;  %v621_v52 = vadd.f32 %v619_v36, %v521_v5 }
 0x145   :  { %v3356_v12 = vstv %s1895_s7  ;;  %v3358_v40 = vstv %s3346_s17  ;;  %v867_v45 = vadd.f32 %v3361_v46, %v862_v51  ;;  %v967_v13 = vadd.f32 %v965_v1, %v962_v22 }
 0x146   :  { %v588_v8 = vmul.f32 %v3356_v12, %v3355_v57  ;;  %v835_v18 = vmul.f32 %v3358_v40, %v3357_v28  ;;  %v3360_v17 = vmov %v3358_v40  ;;  %v970_v26 = vadd.f32 %v968_v58, %v870_v7 }
 0x147   :  { %v836_v32 = vmul.f32 %v3360_v17, %v3359_v34  ;;  %v1067_v19 = vadd.f32 %v1065_v60, %v1062_v49  ;;  %v769_v35 = vadd.f32 %v3344_v48, %v621_v52  ;;  %v3362_v50 = vstv %s1955_s27  ;;  %s1519_s27 = smov 80  }
 0x148   :  { %v392_v59 = vmul.f32 %v3362_v50, %v2389_v9  ;;  %v3363_v56 = vmov %v3362_v50  ;;  %v3364_v63 = vstv %s3352_s18  ;;  %v1070_v4 = vadd.f32 %v1068_v38, %v970_v26  ;;  %v3379_v26 = vld [vmem:[#allocation80_spill] sm:$0xff] }
 0x149   :  { %v393_v30 = vmul.f32 %v3363_v56, %v2392_v3  ;;  %v484_v23 = vmul.f32 %v3364_v63, %v3276_v37  ;;  %v3365_v31 = vmov %v3364_v63  ;;  %v3366_v27 = vstv %s3354_s22  ;;  %v3369_v3 = vld [vmem:[#allocation112_spill] sm:$0xff]  ;;  %v3370_v37 = vld [vmem:[#allocation113_spill] sm:$0xff] }
 0x14a   :  { %v485_v55 = vmul.f32 %v3365_v31, %v2273_v39  ;;  %v584_v6 = vmul.f32 %v3366_v27, %v2329_v0  ;;  %v3367_v48 = vmov %v3366_v27  ;;  %v869_v9 = vadd.f32 %v867_v45, %v769_v35  ;;  %1208 = vrot.lane.b32.xlu1 %v1070_v4, %s1519_s27  ;;  %v1079_v31 = vld [vmem:[#allocation9 + $0x10] ss:$8 sm:$0x3] }
 0x14b   :  { %v585_v51 = vmul.f32 %v3367_v48, %v2332_v54  ;;  %v397_v22 = vadd.f32 %v3368_v53, %v392_v59  ;;  %v398_v14 = vadd.f32 %v3369_v3, %v393_v30  ;;  %v489_v1 = vadd.f32 %v3370_v37, %v484_v23  ;;  %v3381_v27 = vld [vmem:[#allocation21_spill] sm:$0xff]  ;;  %v3382_v48 = vld [vmem:[#allocation22_spill] sm:$0xff] }
 0x14c   :  { %v490_v39 = vadd.f32 %v488_v41, %v485_v55  ;;  %v589_v20 = vadd.f32 %v587_v11, %v584_v6  ;;  %v3371_v0 = vstv %s1962_s10  ;;  %v969_v54 = vadd.f32 %v967_v13, %v869_v9  ;;  %v1125_v55 = vld [vmem:[#allocation9 + $0x12] ss:$8 sm:$0x3] }
 0x14d   :  { %v590_v5 = vadd.f32 %v588_v8, %v585_v51  ;;  %v832_v42 = vmul.f32 %v3371_v0, %v2377_v21  ;;  %v491_v36 = vadd.f32 %v489_v1, %v397_v22  ;;  %v3372_v24 = vmov %v3371_v0 }
 0x14e   :  { %v833_v60 = vmul.f32 %v3372_v24, %v2380_v33  ;;  %v3373_v7 = vstv %s1972_s21  ;;  %v492_v38 = vadd.f32 %v490_v39, %v398_v14  ;;  %v3375_v49 = vstv %s1974_s1  ;;  %s3383_s1 = sld [smem:[#allocation114_spill]]  ;;  %s1520_s21 = smov [#allocation12]  }
 0x14f   :  { %v932_v58 = vmul.f32 %v3373_v7, %v2423_v2  ;;  %v837_v25 = vadd.f32 %v835_v18, %v832_v42  ;;  %v3374_v41 = vmov %v3373_v7  ;;  %v935_v52 = vmul.f32 %v3375_v49, %v2435_v62  ;;  %s1279_s16 = sshll.u32 %s1520_s21, 4  ;;  %s1280_s16 = int_to_ptr.vmem [resolvable:$true] %s1279_s16 }
 0x150   :  { %v933_v11 = vmul.f32 %v3374_v41, %v2426_v61  ;;  %v1069_v21 = vadd.f32 %v1067_v19, %v969_v54  ;;  %v591_v57 = vadd.f32 %v589_v20, %v491_v36  ;;  %v838_v12 = vadd.f32 %v836_v32, %v833_v60  ;;  %v1142_v36 = vld [vmem:[#allocation9 + $0x13] ss:$8 sm:$0x3]  ;;  %s1472_s23 = scalar_lea.vmem %s1280_s16, 256  ;;  %p1477_p8 = scmp.lt.s32.totalorder %s1280_s16, %s1280_s16 }
 0x151   :  { %v3376_v8 = vmov %v3375_v49  ;;  %v592_v33 = vadd.f32 %v590_v5, %v492_v38  ;;  %v937_v40 = vadd.f32 %v935_v52, %v932_v58  ;;  %v3377_v2 = vstv %s1978_s25  ;;  %p1473_p7 = scmp.ne.s32.totalorder %s1280_s16, %s1472_s23  ;;  %p1478_p9 = scmp.lt.s32.totalorder %s1472_s23, %s1472_s23 }
 0x152   :  { %v936_v28 = vmul.f32 %v3376_v8, %v2438_v44  ;;  %v1032_v34 = vmul.f32 %v3377_v2, %v2467_v43  ;;  %v3378_v17 = vmov %v3377_v2  ;;  %1206 = vrot.lane.b32.xlu0 %v1069_v21, %s1519_s27  ;;  %v715_v61 = vadd.f32 %v3379_v26, %v591_v57  ;;  %v1190_v57 = vld [vmem:[#allocation9 + $0x15] ss:$8 sm:$0x3] }
 0x153   :  { %v1033_v18 = vmul.f32 %v3378_v17, %v2470_v29  ;;  %v1035_v62 = vmul.f32 %v1034_v15, %v2491_v16  ;;  %v1036_v32 = vmul.f32 %v1034_v15, %v2494_v10  ;;  %v3380_v44 = vcombine.high %v3379_v26, %v3379_v26  ;;  %v1101_v16 = vld [vmem:[#allocation9 + $0x11] ss:$8 sm:$0x3]  ;;  %p1479_p10 = por %p1478_p9, %p1477_p8 }
 0x154   :  { %v938_v46 = vadd.f32 %v936_v28, %v933_v11  ;;  %v839_v13 = vadd.f32 %v837_v25, %v715_v61  ;;  %v1106_v6 = vrot.slane %v1101_v16, %v3381_v27  ;;  %v1110_v51 = vrot.slane %v1101_v16, %v3382_v48  ;;  %v1166_v25 = vld [vmem:[#allocation9 + $0x14] ss:$8 sm:$0x3] }
 0x155   :  { %v716_v45 = vadd.f32 %v3380_v44, %v592_v33  ;;  %v1037_v19 = vadd.f32 %v1035_v62, %v1032_v34  ;;  %v1038_v43 = vadd.f32 %v1036_v32, %v1033_v18  ;;  %v1084_v22 = vrot.slane %v1079_v31, %v3381_v27  ;;  %v1214_v32 = vld [vmem:[#allocation9 + $0x16] ss:$8 sm:$0x3]  ;;  %p1480_p11 = pnand %p1479_p10, %p1473_p7 }
 0x156   :  { %v939_v50 = vadd.f32 %v937_v40, %v839_v13  ;;  %v1088_v3 = vrot.slane %v1079_v31, %v3382_v48  ;;  %v1130_v14 = vrot.slane %v1125_v55, %v3381_v27  ;;  %v1134_v37 = vrot.slane %v1125_v55, %v3382_v48 }
 0x157   :  { %v840_v35 = vadd.f32 %v838_v12, %v716_v45  ;;  %v1147_v41 = vrot.slane %v1142_v36, %v3381_v27  ;;  %v1151_v52 = vrot.slane %v1142_v36, %v3382_v48  ;;  %v1171_v21 = vrot.slane %v1166_v25, %v3381_v27  ;;  %v1260_v36 = vld [vmem:[#allocation5 + $0x8] sm:$0xf0] }
 0x158   :  { %v1039_v59 = vadd.f32 %v1037_v19, %v939_v50  ;;  %v1175_v28 = vrot.slane %v1166_v25, %v3382_v48  ;;  %v1195_v26 = vrot.slane %v1190_v57, %v3381_v27  ;;  %v1199_v61 = vrot.slane %v1190_v57, %v3382_v48 }
 0x159   :  { %v940_v29 = vadd.f32 %v938_v46, %v840_v35  ;;  %v1230_v47 = vstv %s3383_s1 }
 0x15a   :  { %v1154_v17 = vmul.f32 %v1147_v41, %v1039_v59  ;;  %v1223_v59 = vrot.slane %v1214_v32, %v3382_v48 }
 0x15b   :  { %v1040_v56 = vadd.f32 %v1038_v43, %v940_v29  ;;  %v1219_v29 = vrot.slane %v1214_v32, %v3381_v27 }
 0x15d   :  { %v1155_v18 = vmul.f32 %v1151_v52, %v1040_v56 }
 0x17e   :  { %v1074_v30 = vpop.permute.xlu1 %1073  ;;  %v1072_v63 = vpop.permute.xlu0 %1071 }
 0x17f   :  { %v1076_v1 = vsel %vm1075_vm10, %v1072_v63, %v1074_v30  ;;  %v1077_v39 = vsel %vm1075_vm10, %v1074_v30, %v1072_v63 }
 0x180   :  { %v1091_v60 = vmul.f32 %v1084_v22, %v1077_v39  ;;  %v1092_v7 = vmul.f32 %v1088_v3, %v1076_v1 }
 0x183   :  { %v1096_v23 = vpop.permute.xlu1 %1095 }
 0x18a   :  { %v1094_v4 = vpop.permute.xlu0 %1093 }
 0x18b   :  { %v1098_v9 = vsel %vm1097_vm9, %v1094_v4, %v1096_v23  ;;  %v1099_v53 = vsel %vm1097_vm9, %v1096_v23, %v1094_v4 }
 0x18c   :  { %v1113_v0 = vmul.f32 %v1106_v6, %v1099_v53  ;;  %v1114_v42 = vmul.f32 %v1110_v51, %v1098_v9 }
 0x18e   :  { %v1115_v11 = vadd.f32 %v1113_v0, %v1091_v60  ;;  %v1116_v49 = vadd.f32 %v1114_v42, %v1092_v7  ;;  %v1246_v42 = vld [vmem:[#allocation5 + $0x8] sm:$0xf] }
 0x194   :  { %v1120_v10 = vpop.permute.xlu1 %1119 }
 0x198   :  { %v1118_v15 = vpop.permute.xlu0 %1117 }
 0x199   :  { %v1122_v20 = vsel %vm1121_vm11, %v1118_v15, %v1120_v10  ;;  %v1123_v5 = vsel %vm1121_vm11, %v1120_v10, %v1118_v15 }
 0x19a   :  { %v1137_v58 = vmul.f32 %v1130_v14, %v1123_v5  ;;  %v1138_v38 = vmul.f32 %v1134_v37, %v1122_v20  ;;  %v1245_v20 = vld [vmem:[#allocation5] sm:$0xf]  ;;  %v1259_v5 = vld [vmem:[#allocation5] sm:$0xf0] }
 0x19c   :  { %v1139_v12 = vadd.f32 %v1137_v58, %v1115_v11  ;;  %v1140_v8 = vadd.f32 %v1138_v38, %v1116_v49 }
 0x19e   :  { %v1156_v44 = vadd.f32 %v1154_v17, %v1139_v12  ;;  %v1157_v45 = vadd.f32 %v1155_v18, %v1140_v8 }
 0x19f   :  { %v1161_v54 = vpop.permute.xlu1 %1160 }
 0x1a6   :  { %v1159_v24 = vpop.permute.xlu0 %1158 }
 0x1a7   :  { %v1163_v2 = vsel %vm1162_vm12, %v1159_v24, %v1161_v54  ;;  %v1164_v34 = vsel %vm1162_vm12, %v1161_v54, %v1159_v24 }
 0x1a8   :  { %v1178_v13 = vmul.f32 %v1171_v21, %v1163_v2  ;;  %v1179_v19 = vmul.f32 %v1175_v28, %v1164_v34 }
 0x1aa   :  { %v1180_v56 = vadd.f32 %v1178_v13, %v1156_v44  ;;  %v1181_v30 = vadd.f32 %v1179_v19, %v1157_v45 }
 0x1ae   :  { %v1185_v33 = vpop.permute.xlu1 %1184 }
 0x1b5   :  { %v1183_v40 = vpop.permute.xlu0 %1182 }
 0x1b6   :  { %v1187_v46 = vsel %vm1186_vm13, %v1183_v40, %v1185_v33  ;;  %v1188_v62 = vsel %vm1186_vm13, %v1185_v33, %v1183_v40 }
 0x1b7   :  { %v1202_v43 = vmul.f32 %v1195_v26, %v1187_v46  ;;  %v1203_v35 = vmul.f32 %v1199_v61, %v1188_v62 }
 0x1b9   :  { %v1204_v16 = vadd.f32 %v1202_v43, %v1180_v56  ;;  %v1205_v10 = vadd.f32 %v1203_v35, %v1181_v30 }
 0x1bc   :  { %v1209_v50 = vpop.permute.xlu1 %1208 }
 0x1c4   :  { %v1207_v63 = vpop.permute.xlu0 %1206 }
 0x1c5   :  { %v1211_v23 = vsel %vm1210_vm14, %v1207_v63, %v1209_v50  ;;  %v1212_v4 = vsel %vm1210_vm14, %v1209_v50, %v1207_v63 }
 0x1c6   :  { %v1226_v15 = vmul.f32 %v1219_v29, %v1211_v23  ;;  %v1227_v31 = vmul.f32 %v1223_v59, %v1212_v4 }
 0x1c8   :  { %v1228_v55 = vadd.f32 %v1226_v15, %v1204_v16  ;;  %v1229_v6 = vadd.f32 %v1227_v31, %v1205_v10 }
 0x1ca   :  { %v1231_v51 = vadd.f32 %v1230_v47, %v1228_v55  ;;  %v1232_v9 = vadd.f32 %v1230_v47, %v1229_v6 }
 0x1cc   :  { %v1387_v53 = vmul.f32 -1.442695, %v1231_v51  ;;  %v1388_v22 = vmul.f32 -1.442695, %v1232_v9 }
 0x1ce   :  { %1408 = vpow2.f32 %v1387_v53 }
 0x1cf   :  { %1410 = vpow2.f32 %v1388_v22 }
 0x1d8   :  { %v1409_v3 = vpop.eup %1408 }
 0x1d9   :  { %v1411_v14 = vpop.eup %1410  ;;  %v1239_v37 = vadd.f32 1.0, %v1409_v3 }
 0x1da   :  { %v1240_v1 = vadd.f32 1.0, %v1411_v14 }
 0x1db   :  { %1412 = vrcp.f32 %v1239_v37 }
 0x1dc   :  { %1414 = vrcp.f32 %v1240_v1 }
 0x1e5   :  { %v1413_v39 = vpop.eup %1412 }
 0x1e6   :  { %v1415_v0 = vpop.eup %1414  ;;  %v1250_v54 = vrot.slane %v1413_v39, %v3381_v27  ;;  %v1264_v24 = vrot.slane %v1413_v39, %v3382_v48 }
 0x1e7   :  { %v1254_v60 = vrot.slane %v1415_v0, %v3381_v27  ;;  %v1268_v7 = vrot.slane %v1415_v0, %v3382_v48 }
 0x1e8   :  { %v1255_v58 = vmul.f32 %v1250_v54, %v1245_v20  ;;  %v1269_v38 = vmul.f32 %v1264_v24, %v1259_v5 }
 0x1e9   :  { %v1256_v25 = vmul.f32 %v1254_v60, %v1246_v42  ;;  %v1270_v41 = vmul.f32 %v1268_v7, %v1260_v36 }
 0x1ea   :  { %1257 = vst [vmem:[#allocation12] sm:$0xf] %v1255_v58  ;;  %1271 = vst [vmem:[#allocation12] sm:$0xf0] %v1269_v38 }
 0x1eb   :  { %1258 = vst [vmem:[#allocation12 + $0x8] sm:$0xf] %v1256_v25  ;;  %1272 = vst [vmem:[#allocation12 + $0x8] sm:$0xf0] %v1270_v41 }
 0x1ec   :  { %1483 = shalt.err (!%p1480_p11)
}
 0x1ed   :  { %s3384_s5 = sld [smem:[#allocation115_spill]] }
 0x1f3   :  { %s1484_s9 = scalar_lea.hbm %s3384_s5, 256 }
 0x1f4   :  { %p1485_p12 = scmp.ne.s32.totalorder %s3384_s5, %s1484_s9  ;;  %p1488_p13 = scmp.lt.u32.totalorder %s1484_s9, %s3384_s5 }
 0x1f6   :  { %p1490_p0 = pnand %p1488_p13, %p1485_p12 }
 0x1f8   :  { %1493 = shalt.err (!%p1490_p0)
}
 0x1f9   :  { %1282 = dma.vmem_to_hbm [thread:$0]  %s1280_s16, 256, %s3384_s5, [#allocation7]  }
 0x1fa   :  { %1500 = dma.done.wait [#allocation7], 256  }
 0x1fb   :  { %1501 = vsyncadd [#allocation7], 4294967040 }
 0x1fc   :  { %1286 = vsyncpa [#allocation6], 1 }
 0x1fd   :  { %1287 = vsyncpa [#allocation10], 1 }
 0x1fe   :  { %1288 = vsyncpa [#allocation7], 1 }
 0x1ff   :  { %1289 = vsyncpa [#allocation8], 1 }

</bundles_post_ra>
